<compile_context>
chip_gen: v7x
topology: tpu7x:2x2x1
jax: 0.10.0
libtpu: 0.0.40
codegen_flags: <defaults>
</compile_context>

<pallas_src>
import functools
import numpy as np
import jax
import jax.numpy as jnp
from jax.experimental import pallas as pl
from jax.experimental.pallas import tpu as pltpu


@functools.lru_cache(maxsize=1)
def _vmem_limit():
    """Generation-aware scoped-VMEM limit (~3/4 of physical, capped at 112 MiB)."""
    try:
        cap = int(pltpu.get_tpu_info().vmem_capacity_bytes)
    except Exception:
        cap = 64 * 1024 * 1024            # conservative fallback (v7x physical)
    return min((cap * 3) // 4, 112 * 1024 * 1024)


# ----------------------------------------------------------------------------
# Shared math helpers (used by both the Pallas kernels and the JAX reference)
# ----------------------------------------------------------------------------

def _layernorm(v, g, b, eps=1e-5):
    # Matches the book's LayerNorm: biased variance, eps=1e-5. rsqrt -> EUP slot.
    mean = jnp.mean(v, axis=-1, keepdims=True)
    var = jnp.mean(jnp.square(v - mean), axis=-1, keepdims=True)
    return (v - mean) * jax.lax.rsqrt(var + eps) * g + b


def _gelu_tanh(x):
    # Book GELU (tanh approximation), f32.
    return 0.5 * x * (1.0 + jnp.tanh(
        jnp.sqrt(2.0 / jnp.pi) * (x + 0.044715 * x ** 3)))


# ----------------------------------------------------------------------------
# Pallas kernels
# ----------------------------------------------------------------------------

def gpt_blocks_kernel(x_ref, wqkvp_ref, vecs_ref, w1_ref, b1_ref, w2_ref,
                      gf_ref, sf_ref, o_ref, acc_ref, *, n_heads, batch):
    """All transformer blocks; one layer per grid step, activation carried in acc_ref.

    x_ref / o_ref / acc_ref : (B*T, D)
    Per-layer (leading L dim squeezed by BlockSpec):
      wqkvp_ref (4, D, D) bf16  -> [wq * 1/sqrt(dh), wk, wv, wproj]
      vecs_ref  (6, D)   f32    -> [bproj, g1, s1, g2, s2, b2]
      w1_ref (D, Dff) bf16, b1_ref (1, Dff) f32, w2_ref (Dff, D) bf16
    gf_ref / sf_ref : final LayerNorm (fused into the last layer's epilogue).
    """
    layer = pl.program_id(0)

    @pl.when(layer == 0)
    def _():
        acc_ref[...] = x_ref[...]

    x = acc_ref[...]                                  # (B*T, D) f32 carried activation
    BT, D = x.shape
    B, H = batch, n_heads
    T = BT // B
    dh = D // H

    w = wqkvp_ref[...]                                # (4, D, D) bf16
    vecs = vecs_ref[...]                              # (6, D) f32
    bproj, g1, s1, g2, s2, b2 = (vecs[i:i + 1] for i in range(6))

    # --- norm1 + multi-head causal attention ---------------------------------
    h1 = _layernorm(x, g1, s1).astype(jnp.bfloat16)
    # Full-width (B*T, D) @ (D, D) bf16 matmuls; attention scale is pre-folded in wq.
    q = jnp.dot(h1, w[0], preferred_element_type=jnp.float32)
    k = jnp.dot(h1, w[1], preferred_element_type=jnp.float32)
    v = jnp.dot(h1, w[2], preferred_element_type=jnp.float32)

    # Single additive causal bias shared by all heads / batch elements.
    row = jax.lax.broadcasted_iota(jnp.int32, (T, T), 0)
    col = jax.lax.broadcasted_iota(jnp.int32, (T, T), 1)
    bias = jnp.where(col > row, jnp.float32(-1e30), jnp.float32(0.0))

    # Per-batch attention with heads as the leading batch dim of the MXU einsums.
    # TODO(synk): replace with a flash-style q/k-tiled grid axis (online softmax)
    #             for long context; (H, T, T) f32 scores do not scale on v7x VMEM.
    ctx_rows = []
    for b in range(B):                                # static unroll; B small at inference
        sl = slice(b * T, (b + 1) * T)
        qb = q[sl].reshape(T, H, dh).transpose(1, 0, 2).astype(jnp.bfloat16)
        kb = k[sl].reshape(T, H, dh).transpose(1, 0, 2).astype(jnp.bfloat16)
        vb = v[sl].reshape(T, H, dh).transpose(1, 0, 2).astype(jnp.bfloat16)
        s = jnp.einsum('hqd,hkd->hqk', qb, kb,
                       preferred_element_type=jnp.float32) + bias[None]
        m = jnp.max(s, axis=-1, keepdims=True)
        e = jnp.exp(s - m)                            # f32 exp (v5e-safe)
        p = e * pl.reciprocal(jnp.sum(e, axis=-1, keepdims=True), approx=True)
        cb = jnp.einsum('hqk,hkd->hqd', p.astype(jnp.bfloat16), vb,
                        preferred_element_type=jnp.float32)
        ctx_rows.append(cb.transpose(1, 0, 2).reshape(T, D))
    att = jnp.concatenate(ctx_rows, axis=0)           # (B*T, D), head-concat layout

    proj = jnp.dot(att.astype(jnp.bfloat16), w[3],
                   preferred_element_type=jnp.float32) + bproj
    x1 = x + proj                                      # residual 1 (drop_shortcut = id)

    # --- norm2 + feed-forward (D -> 4D -> D, tanh-GELU) ----------------------
    # TODO(synk): stream w1/w2 in Dff chunks (extra "arbitrary" grid axis) for
    #             large D under v7x's 64 MiB VMEM.
    h2 = _layernorm(x1, g2, s2).astype(jnp.bfloat16)
    ff = jnp.dot(h2, w1_ref[...], preferred_element_type=jnp.float32) + b1_ref[...]
    ff = _gelu_tanh(ff)
    ff = jnp.dot(ff.astype(jnp.bfloat16), w2_ref[...],
                 preferred_element_type=jnp.float32) + b2
    x2 = x1 + ff                                       # residual 2

    acc_ref[...] = x2                                  # carry to next layer

    @pl.when(layer == pl.num_programs(0) - 1)
    def _():
        # Final LayerNorm fused here -> LM head streams bf16 activations only.
        o_ref[...] = _layernorm(x2, gf_ref[...], sf_ref[...]).astype(jnp.bfloat16)


def lm_head_kernel(h_ref, wout_ref, o_ref):
    """out_head (no bias): (B*T, D) bf16 @ (D, TV) bf16 -> (B*T, TV) f32."""
    o_ref[...] = jnp.dot(h_ref[...], wout_ref[...],
                         preferred_element_type=jnp.float32)


# ----------------------------------------------------------------------------
# Pallas wrappers
# ----------------------------------------------------------------------------

def gpt_blocks_pallas(x, pp, *, n_heads):
    """Run all transformer blocks + final LayerNorm; returns bf16 (B*T, D)."""
    B, T, D = x.shape
    L = pp['wqkvp'].shape[0]
    Dff = pp['w1'].shape[2]
    xf = x.reshape(B * T, D)
    kernel = functools.partial(gpt_blocks_kernel, n_heads=n_heads, batch=B)

    def const_spec(shape):
        zeros = (0,) * len(shape)
        return pl.BlockSpec(shape, lambda l, _z=zeros: _z,
                            pipeline_mode=pl.Buffered(1))   # resident, single buffer

    def layer_spec(shape):
        nz = (0,) * len(shape)
        return pl.BlockSpec((pl.Squeezed(),) + tuple(shape),
                            lambda l, _z=nz: (l,) + _z)     # streamed over layers

    return pl.pallas_call(
        kernel,
        out_shape=jax.ShapeDtypeStruct((B * T, D), jnp.bfloat16),
        grid=(L,),
        in_specs=[
            const_spec((B * T, D)),         # x (consumed at layer 0)
            layer_spec((4, D, D)),          # wq/wk/wv/wproj (bf16, wq pre-scaled)
            layer_spec((6, D)),             # bproj, g1, s1, g2, s2, b2
            layer_spec((D, Dff)),           # w1
            layer_spec((1, Dff)),           # b1
            layer_spec((Dff, D)),           # w2
            const_spec((1, D)),             # gf (final LayerNorm)
            const_spec((1, D)),             # sf
        ],
        out_specs=pl.BlockSpec((B * T, D), lambda l: (0, 0)),   # constant across layers
        scratch_shapes=[pltpu.VMEM((B * T, D), jnp.float32)],   # carried activation
        compiler_params=pltpu.CompilerParams(
            dimension_semantics=("arbitrary",),
            vmem_limit_bytes=_vmem_limit()),
    )(xf, pp['wqkvp'], pp['vecs'], pp['w1'], pp['b1'], pp['w2'],
      pp['gf'], pp['sf'])


def lm_head_pallas(h, wout, *, v_tile=4096):
    """LM head over flattened activations; wout streamed exactly once over vocab tiles."""
    BT, D = h.shape
    V = wout.shape[1]
    tv = min(v_tile, V)
    # TODO(synk): emit bf16 logits (or a last-token-only decode path) to halve the
    #             dominant HBM write; kept f32 to match the module's semantics.
    return pl.pallas_call(
        lm_head_kernel,
        out_shape=jax.ShapeDtypeStruct((BT, V), jnp.float32),
        grid=(pl.cdiv(V, tv),),
        in_specs=[
            pl.BlockSpec((BT, D), lambda j: (0, 0),
                         pipeline_mode=pl.Buffered(1)),          # resident activations
            pl.BlockSpec((D, tv), lambda j: (0, j)),             # streamed vocab tiles
        ],
        out_specs=pl.BlockSpec((BT, tv), lambda j: (0, j)),      # lane-dense output tiles
        compiler_params=pltpu.CompilerParams(
            dimension_semantics=("parallel",),
            vmem_limit_bytes=_vmem_limit()),
    )(h, wout)


# ----------------------------------------------------------------------------
# Model assembly (plain-JAX glue: embedding gather, sinusoidal PE)
# ----------------------------------------------------------------------------

def positional_encoding(seq_len, d_model):
    # Standard sinusoidal PE (matches the PyTorch PositionalEncoding buffer pe[:, :T, :]).
    position = jnp.arange(seq_len, dtype=jnp.float32)[:, None]
    div_term = jnp.exp(jnp.arange(0, d_model, 2, dtype=jnp.float32)
                       * (-jnp.log(10000.0) / d_model))
    pe = jnp.zeros((seq_len, d_model), dtype=jnp.float32)
    pe = pe.at[:, 0::2].set(jnp.sin(position * div_term))
    pe = pe.at[:, 1::2].set(jnp.cos(position * div_term))
    return pe[None]  # (1, T, D)


def prepare_params(params, n_heads):
    """Stack per-layer weights along L, fold 1/sqrt(dh) into wq, pack small vectors."""
    layers = params['layers']
    D = layers[0]['wq'].shape[0]
    dh = D // n_heads
    scale = 1.0 / np.sqrt(dh)
    wqkvp = jnp.stack([
        jnp.stack([(l['wq'].astype(jnp.float32) * scale).astype(jnp.bfloat16),
                   l['wk'], l['wv'], l['wproj']], axis=0)
        for l in layers], axis=0)                                      # (L, 4, D, D) bf16
    vecs = jnp.stack([
        jnp.concatenate([l['bproj'], l['g1'], l['s1'], l['g2'], l['s2'], l['b2']],
                        axis=0)
        for l in layers], axis=0)                                      # (L, 6, D) f32
    return {
        'tok_emb': params['tok_emb'],
        'wqkvp': wqkvp,
        'vecs': vecs,
        'w1': jnp.stack([l['w1'] for l in layers], axis=0),            # (L, D, Dff) bf16
        'b1': jnp.stack([l['b1'] for l in layers], axis=0),            # (L, 1, Dff) f32
        'w2': jnp.stack([l['w2'] for l in layers], axis=0),            # (L, Dff, D) bf16
        'gf': params['gf'], 'sf': params['sf'],
        'wout': params['wout'],
    }


@functools.partial(jax.jit, static_argnames=('n_heads',))
def gpt_forward_pallas(in_idx, prepared, *, n_heads):
    tok = prepared['tok_emb'][in_idx]                    # (B, T, D), plain-JAX gather
    B, T = in_idx.shape
    D = tok.shape[-1]
    x = tok + positional_encoding(T, D)                  # drop_emb = identity (eval)
    h = gpt_blocks_pallas(x, prepared, n_heads=n_heads)  # (B*T, D) bf16, final LN fused
    logits = lm_head_pallas(h, prepared['wout'])         # (B*T, V) f32
    return logits.reshape(B, T, -1)


# ----------------------------------------------------------------------------
# Pure-JAX reference (same compute recipe: bf16 matmul operands, f32 accumulate)
# ----------------------------------------------------------------------------

def gpt_forward_ref(in_idx, params, *, n_heads):
    tok = params['tok_emb'][in_idx]
    B, T, D = tok.shape
    dh = D // n_heads
    scale = 1.0 / np.sqrt(dh)
    x = tok + positional_encoding(T, D)
    mask = jnp.asarray(np.arange(T)[None, :] > np.arange(T)[:, None])   # (T, T)

    for p in params['layers']:
        shortcut = x
        h1 = _layernorm(x, p['g1'], p['s1']).astype(jnp.bfloat16)
        q = jnp.einsum('btd,de->bte', h1, p['wq'], preferred_element_type=jnp.float32)
        k = jnp.einsum('btd,de->bte', h1, p['wk'], preferred_element_type=jnp.float32)
        v = jnp.einsum('btd,de->bte', h1, p['wv'], preferred_element_type=jnp.float32)
        qh = (q * scale).reshape(B, T, n_heads, dh).astype(jnp.bfloat16)
        kh = k.reshape(B, T, n_heads, dh).astype(jnp.bfloat16)
        vh = v.reshape(B, T, n_heads, dh).astype(jnp.bfloat16)
        s = jnp.einsum('bqhd,bkhd->bhqk', qh, kh, preferred_element_type=jnp.float32)
        s = jnp.where(mask, jnp.float32(-1e30), s)
        p_att = jax.nn.softmax(s, axis=-1)
        ctx = jnp.einsum('bhqk,bkhd->bqhd', p_att.astype(jnp.bfloat16), vh,
                         preferred_element_type=jnp.float32).reshape(B, T, D)
        proj = jnp.einsum('btd,de->bte', ctx.astype(jnp.bfloat16), p['wproj'],
                          preferred_element_type=jnp.float32) + p['bproj']
        x = shortcut + proj
        shortcut = x
        h2 = _layernorm(x, p['g2'], p['s2']).astype(jnp.bfloat16)
        ff = jnp.einsum('btd,df->btf', h2, p['w1'],
                        preferred_element_type=jnp.float32) + p['b1']
        ff = _gelu_tanh(ff).astype(jnp.bfloat16)
        ff = jnp.einsum('btf,fd->btd', ff, p['w2'],
                        preferred_element_type=jnp.float32) + p['b2']
        x = shortcut + ff

    h = _layernorm(x, params['gf'], params['sf']).astype(jnp.bfloat16)
    return jnp.einsum('btd,dv->btv', h, params['wout'],
                      preferred_element_type=jnp.float32)


# ----------------------------------------------------------------------------
# Deterministic parameter init + run
# ----------------------------------------------------------------------------

def init_params(key, cfg):
    D = cfg['emb_dim']
    V = cfg['vocab_size']
    Dff = 4 * D

    def uni(key, shape, fan_in, dtype=jnp.bfloat16):
        bound = 1.0 / np.sqrt(fan_in)
        return jax.random.uniform(key, shape, jnp.float32, -bound, bound).astype(dtype)

    keys = iter(jax.random.split(key, 4 + 10 * cfg['n_layers']))
    params = {
        'tok_emb': 0.02 * jax.random.normal(next(keys), (V, D), jnp.float32),
        'gf': jnp.ones((1, D), jnp.float32),
        'sf': jnp.zeros((1, D), jnp.float32),
        'wout': uni(next(keys), (D, V), D),               # bf16 matmul weight
        'layers': [],
    }
    for _ in range(cfg['n_layers']):
        # qkv_bias=False in this config. Fused per-head weights: head h lives in
        # columns [h*dh:(h+1)*dh] of wq/wk/wv (matches MultiHeadAttentionWrapper concat).
        layer = {
            'wq': uni(next(keys), (D, D), D),
            'wk': uni(next(keys), (D, D), D),
            'wv': uni(next(keys), (D, D), D),
            'wproj': uni(next(keys), (D, D), D),
            'bproj': uni(next(keys), (1, D), D, jnp.float32),
            'g1': jnp.ones((1, D), jnp.float32),
            's1': jnp.zeros((1, D), jnp.float32),
            'g2': jnp.ones((1, D), jnp.float32),
            's2': jnp.zeros((1, D), jnp.float32),
            'w1': uni(next(keys), (D, Dff), D),
            'b1': uni(next(keys), (1, Dff), D, jnp.float32),
            'w2': uni(next(keys), (Dff, D), Dff),
            'b2': uni(next(keys), (1, D), Dff, jnp.float32),
        }
        params['layers'].append(layer)
    return params


if __name__ == "__main__":
    cfg = dict(vocab_size=64, emb_dim=32, n_heads=4, context_length=8,
               n_layers=2, drop_rate=0.0, qkv_bias=False)
    B, T = 2, 8

    key = jax.random.PRNGKey(0)
    k_par, k_idx = jax.random.split(key)
    params = init_params(k_par, cfg)
    prepared = prepare_params(params, cfg['n_heads'])
    in_idx = jax.random.randint(k_idx, (B, T), 0, cfg['vocab_size'], dtype=jnp.int32)

    logits = gpt_forward_pallas(in_idx, prepared, n_heads=cfg['n_heads'])
    logits = jax.block_until_ready(logits)
    assert logits.shape == (B, T, cfg['vocab_size'])
    assert logits.dtype == jnp.float32

    ref = jax.block_until_ready(gpt_forward_ref(in_idx, params, n_heads=cfg['n_heads']))
    np.testing.assert_allclose(np.asarray(logits), np.asarray(ref),
                               rtol=2e-2, atol=2e-2)

    print("KERNEL_OK")
</pallas_src>

<mosaic_0001>
module attributes {stable_mosaic.version = 11 : i64} {
  func.func @lm_head_kernel(%arg0: i32, %arg1: memref<16x32xbf16, #tpu.memory_space<vmem>>, %arg2: memref<32x64xbf16, #tpu.memory_space<vmem>>, %arg3: memref<16x64xf32, #tpu.memory_space<vmem>>) attributes {dimension_semantics = [#tpu.dimension_semantics<parallel>], iteration_bounds = array<i64: 1>, scalar_prefetch = 0 : i64, scratch_operands = 0 : i64, tpu.core_type = #tpu.core_type<tc>, window_params = [{pipeline_mode = #tpu.pipeline_mode<synchronous>, transform_indices = @transform_0, window_bounds = array<i64: 16, 32>}, {transform_indices = @transform_1, window_bounds = array<i64: 32, 64>}, {transform_indices = @transform_2, window_bounds = array<i64: 16, 64>}]} {
    %c0 = arith.constant 0 : index
    %c0_0 = arith.constant 0 : index
    %0 = vector.load %arg1[%c0, %c0_0] : memref<16x32xbf16, #tpu.memory_space<vmem>>, vector<16x32xbf16>
    %c0_1 = arith.constant 0 : index
    %c0_2 = arith.constant 0 : index
    %1 = vector.load %arg2[%c0_1, %c0_2] : memref<32x64xbf16, #tpu.memory_space<vmem>>, vector<32x64xbf16>
    %cst = arith.constant dense<0.000000e+00> : vector<16x64xf32>
    %2 = tpu.matmul %0, %1, %cst {dimension_numbers = #tpu.dot_dimension_numbers<[1], [0], [0], [1], [0, 0, 1, 1], [], []>} : vector<16x32xbf16>, vector<32x64xbf16>, vector<16x64xf32> -> vector<16x64xf32>
    %c0_3 = arith.constant 0 : index
    %c0_4 = arith.constant 0 : index
    %3 = vector.load %arg3[%c0_3, %c0_4] : memref<16x64xf32, #tpu.memory_space<vmem>>, vector<16x64xf32>
    tpu.vector_store %arg3[%c0_3, %c0_4], %2 {strides = array<i32>} : memref<16x64xf32, #tpu.memory_space<vmem>>, vector<16x64xf32>,
    return
  }
  func.func @transform_0(%arg0: i32) -> (i32, i32) {
    %c0_i32 = arith.constant 0 : i32
    %c0_i32_0 = arith.constant 0 : i32
    %c0_i32_1 = arith.constant 0 : i32
    return %c0_i32, %c0_i32_0 : i32, i32
  }
  func.func @transform_1(%arg0: i32) -> (i32, i32) {
    %c0_i32 = arith.constant 0 : i32
    %c0_i32_0 = arith.constant 0 : i32
    return %c0_i32, %arg0 : i32, i32
  }
  func.func @transform_2(%arg0: i32) -> (i32, i32) {
    %c0_i32 = arith.constant 0 : i32
    %c0_i32_0 = arith.constant 0 : i32
    return %c0_i32, %arg0 : i32, i32
  }
}

module attributes {stable_mosaic.version = 11 : i64} {
  func.func @gpt_blocks_kernel(%arg0: i32, %arg1: memref<16x32xf32, #tpu.memory_space<vmem>>, %arg2: memref<1x4x32x32xbf16, #tpu.memory_space<vmem>>, %arg3: memref<1x6x32xf32, #tpu.memory_space<vmem>>, %arg4: memref<1x32x128xbf16, #tpu.memory_space<vmem>>, %arg5: memref<1x1x128xf32, #tpu.memory_space<vmem>>, %arg6: memref<1x128x32xbf16, #tpu.memory_space<vmem>>, %arg7: memref<1x32xf32, #tpu.memory_space<vmem>>, %arg8: memref<1x32xf32, #tpu.memory_space<vmem>>, %arg9: memref<16x32xbf16, #tpu.memory_space<vmem>>, %arg10: memref<16x32xf32, #tpu.memory_space<vmem>>) attributes {dimension_semantics = [#tpu.dimension_semantics<arbitrary>], iteration_bounds = array<i64: 2>, scalar_prefetch = 0 : i64, scratch_operands = 1 : i64, tpu.core_type = #tpu.core_type<tc>, window_params = [{pipeline_mode = #tpu.pipeline_mode<synchronous>, transform_indices = @transform_0, window_bounds = array<i64: 16, 32>}, {transform_indices = @transform_1, window_bounds = array<i64: 1, 4, 32, 32>}, {transform_indices = @transform_2, window_bounds = array<i64: 1, 6, 32>}, {transform_indices = @transform_3, window_bounds = array<i64: 1, 32, 128>}, {transform_indices = @transform_4, window_bounds = array<i64: 1, 1, 128>}, {transform_indices = @transform_5, window_bounds = array<i64: 1, 128, 32>}, {pipeline_mode = #tpu.pipeline_mode<synchronous>, transform_indices = @transform_6, window_bounds = array<i64: 1, 32>}, {pipeline_mode = #tpu.pipeline_mode<synchronous>, transform_indices = @transform_7, window_bounds = array<i64: 1, 32>}, {pipeline_mode = #tpu.pipeline_mode<synchronous>, transform_indices = @transform_8, window_bounds = array<i64: 16, 32>}]} {
    %c0_i32 = arith.constant 0 : i32
    %0 = arith.cmpi eq, %arg0, %c0_i32 : i32
    %1 = arith.extui %0 : i1 to i32
    %c0_i32_0 = arith.constant 0 : i32
    %2 = arith.cmpi ne, %1, %c0_i32_0 : i32
    scf.if %2 {
      %c0_50 = arith.constant 0 : index
      %c0_51 = arith.constant 0 : index
      %175 = vector.load %arg1[%c0_50, %c0_51] : memref<16x32xf32, #tpu.memory_space<vmem>>, vector<16x32xf32>
      %c0_52 = arith.constant 0 : index
      %c0_53 = arith.constant 0 : index
      %176 = vector.load %arg10[%c0_52, %c0_53] : memref<16x32xf32, #tpu.memory_space<vmem>>, vector<16x32xf32>
      tpu.vector_store %arg10[%c0_52, %c0_53], %175 {strides = array<i32>} : memref<16x32xf32, #tpu.memory_space<vmem>>, vector<16x32xf32>,
    } else {
    }
    %c0 = arith.constant 0 : index
    %c0_1 = arith.constant 0 : index
    %3 = vector.load %arg10[%c0, %c0_1] : memref<16x32xf32, #tpu.memory_space<vmem>>, vector<16x32xf32>
    %c0_2 = arith.constant 0 : index
    %c0_3 = arith.constant 0 : index
    %c0_4 = arith.constant 0 : index
    %c0_5 = arith.constant 0 : index
    %4 = vector.load %arg2[%c0_2, %c0_3, %c0_4, %c0_5] : memref<1x4x32x32xbf16, #tpu.memory_space<vmem>>, vector<1x4x32x32xbf16>
    %5 = vector.shape_cast %4 : vector<1x4x32x32xbf16> to vector<4x32x32xbf16>
    %c0_6 = arith.constant 0 : index
    %c0_7 = arith.constant 0 : index
    %c0_8 = arith.constant 0 : index
    %6 = vector.load %arg3[%c0_6, %c0_7, %c0_8] : memref<1x6x32xf32, #tpu.memory_space<vmem>>, vector<1x6x32xf32>
    %7 = vector.shape_cast %6 : vector<1x6x32xf32> to vector<6x32xf32>
    %8 = vector.extract_strided_slice %7 {offsets = [0, 0], sizes = [1, 32], strides = [1, 1]} : vector<6x32xf32> to vector<1x32xf32>
    %9 = vector.extract_strided_slice %7 {offsets = [1, 0], sizes = [1, 32], strides = [1, 1]} : vector<6x32xf32> to vector<1x32xf32>
    %10 = vector.extract_strided_slice %7 {offsets = [2, 0], sizes = [1, 32], strides = [1, 1]} : vector<6x32xf32> to vector<1x32xf32>
    %11 = vector.extract_strided_slice %7 {offsets = [3, 0], sizes = [1, 32], strides = [1, 1]} : vector<6x32xf32> to vector<1x32xf32>
    %12 = vector.extract_strided_slice %7 {offsets = [4, 0], sizes = [1, 32], strides = [1, 1]} : vector<6x32xf32> to vector<1x32xf32>
    %13 = vector.extract_strided_slice %7 {offsets = [5, 0], sizes = [1, 32], strides = [1, 1]} : vector<6x32xf32> to vector<1x32xf32>
    %cst = arith.constant dense<0.000000e+00> : vector<16xf32>
    %14 = vector.multi_reduction <add>, %3, %cst [1] : vector<16x32xf32> to vector<16xf32>
    %15 = vector.shape_cast %14 : vector<16xf32> to vector<16x1xf32>
    %cst_9 = arith.constant 3.200000e+01 : f32
    %16 = vector.broadcast %cst_9 : f32 to vector<16x1xf32>
    %17 = arith.divf %15, %16 : vector<16x1xf32>
    %18 = vector.broadcast %17 : vector<16x1xf32> to vector<16x32xf32>
    %19 = arith.subf %3, %18 : vector<16x32xf32>
    %20 = arith.mulf %19, %19 : vector<16x32xf32>
    %cst_10 = arith.constant dense<0.000000e+00> : vector<16xf32>
    %21 = vector.multi_reduction <add>, %20, %cst_10 [1] : vector<16x32xf32> to vector<16xf32>
    %22 = vector.shape_cast %21 : vector<16xf32> to vector<16x1xf32>
    %cst_11 = arith.constant 3.200000e+01 : f32
    %23 = vector.broadcast %cst_11 : f32 to vector<16x1xf32>
    %24 = arith.divf %22, %23 : vector<16x1xf32>
    %25 = vector.broadcast %17 : vector<16x1xf32> to vector<16x32xf32>
    %26 = arith.subf %3, %25 : vector<16x32xf32>
    %cst_12 = arith.constant 9.99999974E-6 : f32
    %27 = vector.broadcast %cst_12 : f32 to vector<16x1xf32>
    %28 = arith.addf %24, %27 : vector<16x1xf32>
    %29 = math.rsqrt %28 : vector<16x1xf32>
    %30 = vector.broadcast %29 : vector<16x1xf32> to vector<16x32xf32>
    %31 = arith.mulf %26, %30 : vector<16x32xf32>
    %32 = vector.broadcast %9 : vector<1x32xf32> to vector<16x32xf32>
    %33 = arith.mulf %31, %32 : vector<16x32xf32>
    %34 = vector.broadcast %10 : vector<1x32xf32> to vector<16x32xf32>
    %35 = arith.addf %33, %34 : vector<16x32xf32>
    %36 = arith.truncf %35 : vector<16x32xf32> to vector<16x32xbf16>
    %37 = vector.extract_strided_slice %5 {offsets = [0, 0, 0], sizes = [1, 32, 32], strides = [1, 1, 1]} : vector<4x32x32xbf16> to vector<1x32x32xbf16>
    %38 = vector.shape_cast %37 : vector<1x32x32xbf16> to vector<32x32xbf16>
    %cst_13 = arith.constant dense<0.000000e+00> : vector<16x32xf32>
    %39 = tpu.matmul %36, %38, %cst_13 {dimension_numbers = #tpu.dot_dimension_numbers<[1], [0], [0], [1], [0, 0, 1, 1], [], []>} : vector<16x32xbf16>, vector<32x32xbf16>, vector<16x32xf32> -> vector<16x32xf32>
    %40 = vector.extract_strided_slice %5 {offsets = [1, 0, 0], sizes = [1, 32, 32], strides = [1, 1, 1]} : vector<4x32x32xbf16> to vector<1x32x32xbf16>
    %41 = vector.shape_cast %40 : vector<1x32x32xbf16> to vector<32x32xbf16>
    %cst_14 = arith.constant dense<0.000000e+00> : vector<16x32xf32>
    %42 = tpu.matmul %36, %41, %cst_14 {dimension_numbers = #tpu.dot_dimension_numbers<[1], [0], [0], [1], [0, 0, 1, 1], [], []>} : vector<16x32xbf16>, vector<32x32xbf16>, vector<16x32xf32> -> vector<16x32xf32>
    %43 = vector.extract_strided_slice %5 {offsets = [2, 0, 0], sizes = [1, 32, 32], strides = [1, 1, 1]} : vector<4x32x32xbf16> to vector<1x32x32xbf16>
    %44 = vector.shape_cast %43 : vector<1x32x32xbf16> to vector<32x32xbf16>
    %cst_15 = arith.constant dense<0.000000e+00> : vector<16x32xf32>
    %45 = tpu.matmul %36, %44, %cst_15 {dimension_numbers = #tpu.dot_dimension_numbers<[1], [0], [0], [1], [0, 0, 1, 1], [], []>} : vector<16x32xbf16>, vector<32x32xbf16>, vector<16x32xf32> -> vector<16x32xf32>
    %46 = tpu.iota {dimensions = array<i32: 0>} : vector<8x8xi32>
    %47 = tpu.iota {dimensions = array<i32: 1>} : vector<8x8xi32>
    %48 = arith.cmpi sgt, %47, %46 : vector<8x8xi32>
    %cst_16 = arith.constant -1.000000e+30 : f32
    %cst_17 = arith.constant 0.000000e+00 : f32
    %49 = vector.broadcast %cst_16 : f32 to vector<8x8xf32>
    %50 = vector.broadcast %cst_17 : f32 to vector<8x8xf32>
    %51 = arith.select %48, %49, %50 : vector<8x8xi1>, vector<8x8xf32>
    %52 = vector.extract_strided_slice %39 {offsets = [0, 0], sizes = [8, 32], strides = [1, 1]} : vector<16x32xf32> to vector<8x32xf32>
    %53 = vector.shape_cast %52 : vector<8x32xf32> to vector<8x4x8xf32>
    %54 = tpu.transpose %53, [1, 0, 2] : vector<8x4x8xf32> -> vector<4x8x8xf32>
    %55 = arith.truncf %54 : vector<4x8x8xf32> to vector<4x8x8xbf16>
    %56 = vector.extract_strided_slice %42 {offsets = [0, 0], sizes = [8, 32], strides = [1, 1]} : vector<16x32xf32> to vector<8x32xf32>
    %57 = vector.shape_cast %56 : vector<8x32xf32> to vector<8x4x8xf32>
    %58 = tpu.transpose %57, [1, 0, 2] : vector<8x4x8xf32> -> vector<4x8x8xf32>
    %59 = arith.truncf %58 : vector<4x8x8xf32> to vector<4x8x8xbf16>
    %60 = vector.extract_strided_slice %45 {offsets = [0, 0], sizes = [8, 32], strides = [1, 1]} : vector<16x32xf32> to vector<8x32xf32>
    %61 = vector.shape_cast %60 : vector<8x32xf32> to vector<8x4x8xf32>
    %62 = tpu.transpose %61, [1, 0, 2] : vector<8x4x8xf32> -> vector<4x8x8xf32>
    %63 = arith.truncf %62 : vector<4x8x8xf32> to vector<4x8x8xbf16>
    "tpu.trace_start"() <{level = 10 : i32, message = "hqd,hkd->hqk"}> : () -> ()
    %cst_18 = arith.constant dense<0.000000e+00> : vector<4x8x8xf32>
    %64 = tpu.matmul %55, %59, %cst_18 {dimension_numbers = #tpu.dot_dimension_numbers<[2], [2], [1], [1], [0, 0, 0, 1, 1, 1], [0], [0]>} : vector<4x8x8xbf16>, vector<4x8x8xbf16>, vector<4x8x8xf32> -> vector<4x8x8xf32>
    "tpu.trace_stop"() : () -> ()
    %65 = vector.shape_cast %51 : vector<8x8xf32> to vector<1x8x8xf32>
    %66 = vector.broadcast %65 : vector<1x8x8xf32> to vector<4x8x8xf32>
    %67 = arith.addf %64, %66 : vector<4x8x8xf32>
    %cst_19 = arith.constant dense<0xFF800000> : vector<4x8xf32>
    %68 = vector.multi_reduction <maximumf>, %67, %cst_19 [2] : vector<4x8x8xf32> to vector<4x8xf32>
    %69 = vector.shape_cast %68 : vector<4x8xf32> to vector<4x8x1xf32>
    %70 = vector.broadcast %69 : vector<4x8x1xf32> to vector<4x8x8xf32>
    %71 = arith.subf %67, %70 : vector<4x8x8xf32>
    %72 = math.exp %71 : vector<4x8x8xf32>
    %cst_20 = arith.constant dense<0.000000e+00> : vector<4x8xf32>
    %73 = vector.multi_reduction <add>, %72, %cst_20 [2] : vector<4x8x8xf32> to vector<4x8xf32>
    %74 = vector.shape_cast %73 : vector<4x8xf32> to vector<4x8x1xf32>
    %75 = tpu.reciprocal %74 {approx = true} : vector<4x8x1xf32> -> vector<4x8x1xf32>
    %76 = vector.broadcast %75 : vector<4x8x1xf32> to vector<4x8x8xf32>
    %77 = arith.mulf %72, %76 : vector<4x8x8xf32>
    %78 = arith.truncf %77 : vector<4x8x8xf32> to vector<4x8x8xbf16>
    "tpu.trace_start"() <{level = 10 : i32, message = "hqk,hkd->hqd"}> : () -> ()
    %cst_21 = arith.constant dense<0.000000e+00> : vector<4x8x8xf32>
    %79 = tpu.matmul %78, %63, %cst_21 {dimension_numbers = #tpu.dot_dimension_numbers<[2], [1], [1], [2], [0, 0, 0, 1, 1, 2], [0], [0]>} : vector<4x8x8xbf16>, vector<4x8x8xbf16>, vector<4x8x8xf32> -> vector<4x8x8xf32>
    "tpu.trace_stop"() : () -> ()
    %80 = tpu.transpose %79, [1, 0, 2] : vector<4x8x8xf32> -> vector<8x4x8xf32>
    %81 = vector.shape_cast %80 : vector<8x4x8xf32> to vector<8x32xf32>
    %82 = vector.extract_strided_slice %39 {offsets = [8, 0], sizes = [8, 32], strides = [1, 1]} : vector<16x32xf32> to vector<8x32xf32>
    %83 = vector.shape_cast %82 : vector<8x32xf32> to vector<8x4x8xf32>
    %84 = tpu.transpose %83, [1, 0, 2] : vector<8x4x8xf32> -> vector<4x8x8xf32>
    %85 = arith.truncf %84 : vector<4x8x8xf32> to vector<4x8x8xbf16>
    %86 = vector.extract_strided_slice %42 {offsets = [8, 0], sizes = [8, 32], strides = [1, 1]} : vector<16x32xf32> to vector<8x32xf32>
    %87 = vector.shape_cast %86 : vector<8x32xf32> to vector<8x4x8xf32>
    %88 = tpu.transpose %87, [1, 0, 2] : vector<8x4x8xf32> -> vector<4x8x8xf32>
    %89 = arith.truncf %88 : vector<4x8x8xf32> to vector<4x8x8xbf16>
    %90 = vector.extract_strided_slice %45 {offsets = [8, 0], sizes = [8, 32], strides = [1, 1]} : vector<16x32xf32> to vector<8x32xf32>
    %91 = vector.shape_cast %90 : vector<8x32xf32> to vector<8x4x8xf32>
    %92 = tpu.transpose %91, [1, 0, 2] : vector<8x4x8xf32> -> vector<4x8x8xf32>
    %93 = arith.truncf %92 : vector<4x8x8xf32> to vector<4x8x8xbf16>
    "tpu.trace_start"() <{level = 10 : i32, message = "hqd,hkd->hqk"}> : () -> ()
    %cst_22 = arith.constant dense<0.000000e+00> : vector<4x8x8xf32>
    %94 = tpu.matmul %85, %89, %cst_22 {dimension_numbers = #tpu.dot_dimension_numbers<[2], [2], [1], [1], [0, 0, 0, 1, 1, 1], [0], [0]>} : vector<4x8x8xbf16>, vector<4x8x8xbf16>, vector<4x8x8xf32> -> vector<4x8x8xf32>
    "tpu.trace_stop"() : () -> ()
    %95 = vector.shape_cast %51 : vector<8x8xf32> to vector<1x8x8xf32>
    %96 = vector.broadcast %95 : vector<1x8x8xf32> to vector<4x8x8xf32>
    %97 = arith.addf %94, %96 : vector<4x8x8xf32>
    %cst_23 = arith.constant dense<0xFF800000> : vector<4x8xf32>
    %98 = vector.multi_reduction <maximumf>, %97, %cst_23 [2] : vector<4x8x8xf32> to vector<4x8xf32>
    %99 = vector.shape_cast %98 : vector<4x8xf32> to vector<4x8x1xf32>
    %100 = vector.broadcast %99 : vector<4x8x1xf32> to vector<4x8x8xf32>
    %101 = arith.subf %97, %100 : vector<4x8x8xf32>
    %102 = math.exp %101 : vector<4x8x8xf32>
    %cst_24 = arith.constant dense<0.000000e+00> : vector<4x8xf32>
    %103 = vector.multi_reduction <add>, %102, %cst_24 [2] : vector<4x8x8xf32> to vector<4x8xf32>
    %104 = vector.shape_cast %103 : vector<4x8xf32> to vector<4x8x1xf32>
    %105 = tpu.reciprocal %104 {approx = true} : vector<4x8x1xf32> -> vector<4x8x1xf32>
    %106 = vector.broadcast %105 : vector<4x8x1xf32> to vector<4x8x8xf32>
    %107 = arith.mulf %102, %106 : vector<4x8x8xf32>
    %108 = arith.truncf %107 : vector<4x8x8xf32> to vector<4x8x8xbf16>
    "tpu.trace_start"() <{level = 10 : i32, message = "hqk,hkd->hqd"}> : () -> ()
    %cst_25 = arith.constant dense<0.000000e+00> : vector<4x8x8xf32>
    %109 = tpu.matmul %108, %93, %cst_25 {dimension_numbers = #tpu.dot_dimension_numbers<[2], [1], [1], [2], [0, 0, 0, 1, 1, 2], [0], [0]>} : vector<4x8x8xbf16>, vector<4x8x8xbf16>, vector<4x8x8xf32> -> vector<4x8x8xf32>
    "tpu.trace_stop"() : () -> ()
    %110 = tpu.transpose %109, [1, 0, 2] : vector<4x8x8xf32> -> vector<8x4x8xf32>
    %111 = vector.shape_cast %110 : vector<8x4x8xf32> to vector<8x32xf32>
    %112 = tpu.concatenate %81, %111 in 0 : vector<8x32xf32>, vector<8x32xf32> -> vector<16x32xf32>
    %113 = arith.truncf %112 : vector<16x32xf32> to vector<16x32xbf16>
    %114 = vector.extract_strided_slice %5 {offsets = [3, 0, 0], sizes = [1, 32, 32], strides = [1, 1, 1]} : vector<4x32x32xbf16> to vector<1x32x32xbf16>
    %115 = vector.shape_cast %114 : vector<1x32x32xbf16> to vector<32x32xbf16>
    %cst_26 = arith.constant dense<0.000000e+00> : vector<16x32xf32>
    %116 = tpu.matmul %113, %115, %cst_26 {dimension_numbers = #tpu.dot_dimension_numbers<[1], [0], [0], [1], [0, 0, 1, 1], [], []>} : vector<16x32xbf16>, vector<32x32xbf16>, vector<16x32xf32> -> vector<16x32xf32>
    %117 = vector.broadcast %8 : vector<1x32xf32> to vector<16x32xf32>
    %118 = arith.addf %116, %117 : vector<16x32xf32>
    %119 = arith.addf %3, %118 : vector<16x32xf32>
    %cst_27 = arith.constant dense<0.000000e+00> : vector<16xf32>
    %120 = vector.multi_reduction <add>, %119, %cst_27 [1] : vector<16x32xf32> to vector<16xf32>
    %121 = vector.shape_cast %120 : vector<16xf32> to vector<16x1xf32>
    %cst_28 = arith.constant 3.200000e+01 : f32
    %122 = vector.broadcast %cst_28 : f32 to vector<16x1xf32>
    %123 = arith.divf %121, %122 : vector<16x1xf32>
    %124 = vector.broadcast %123 : vector<16x1xf32> to vector<16x32xf32>
    %125 = arith.subf %119, %124 : vector<16x32xf32>
    %126 = arith.mulf %125, %125 : vector<16x32xf32>
    %cst_29 = arith.constant dense<0.000000e+00> : vector<16xf32>
    %127 = vector.multi_reduction <add>, %126, %cst_29 [1] : vector<16x32xf32> to vector<16xf32>
    %128 = vector.shape_cast %127 : vector<16xf32> to vector<16x1xf32>
    %cst_30 = arith.constant 3.200000e+01 : f32
    %129 = vector.broadcast %cst_30 : f32 to vector<16x1xf32>
    %130 = arith.divf %128, %129 : vector<16x1xf32>
    %131 = vector.broadcast %123 : vector<16x1xf32> to vector<16x32xf32>
    %132 = arith.subf %119, %131 : vector<16x32xf32>
    %cst_31 = arith.constant 9.99999974E-6 : f32
    %133 = vector.broadcast %cst_31 : f32 to vector<16x1xf32>
    %134 = arith.addf %130, %133 : vector<16x1xf32>
    %135 = math.rsqrt %134 : vector<16x1xf32>
    %136 = vector.broadcast %135 : vector<16x1xf32> to vector<16x32xf32>
    %137 = arith.mulf %132, %136 : vector<16x32xf32>
    %138 = vector.broadcast %11 : vector<1x32xf32> to vector<16x32xf32>
    %139 = arith.mulf %137, %138 : vector<16x32xf32>
    %140 = vector.broadcast %12 : vector<1x32xf32> to vector<16x32xf32>
    %141 = arith.addf %139, %140 : vector<16x32xf32>
    %142 = arith.truncf %141 : vector<16x32xf32> to vector<16x32xbf16>
    %c0_32 = arith.constant 0 : index
    %c0_33 = arith.constant 0 : index
    %c0_34 = arith.constant 0 : index
    %143 = vector.load %arg4[%c0_32, %c0_33, %c0_34] : memref<1x32x128xbf16, #tpu.memory_space<vmem>>, vector<1x32x128xbf16>
    %144 = vector.shape_cast %143 : vector<1x32x128xbf16> to vector<32x128xbf16>
    %cst_35 = arith.constant dense<0.000000e+00> : vector<16x128xf32>
    %145 = tpu.matmul %142, %144, %cst_35 {dimension_numbers = #tpu.dot_dimension_numbers<[1], [0], [0], [1], [0, 0, 1, 1], [], []>} : vector<16x32xbf16>, vector<32x128xbf16>, vector<16x128xf32> -> vector<16x128xf32>
    %c0_36 = arith.constant 0 : index
    %c0_37 = arith.constant 0 : index
    %c0_38 = arith.constant 0 : index
    %146 = vector.load %arg5[%c0_36, %c0_37, %c0_38] : memref<1x1x128xf32, #tpu.memory_space<vmem>>, vector<1x1x128xf32>
    %147 = vector.shape_cast %146 : vector<1x1x128xf32> to vector<1x128xf32>
    %148 = vector.broadcast %147 : vector<1x128xf32> to vector<16x128xf32>
    %149 = arith.addf %145, %148 : vector<16x128xf32>
    %cst_39 = arith.constant 5.000000e-01 : f32
    %150 = vector.broadcast %cst_39 : f32 to vector<16x128xf32>
    %151 = arith.mulf %150, %149 : vector<16x128xf32>
    %cst_40 = arith.constant 0.636619746 : f32
    %152 = math.sqrt %cst_40 : f32
    %153 = arith.mulf %149, %149 : vector<16x128xf32>
    %154 = arith.mulf %149, %153 : vector<16x128xf32>
    %cst_41 = arith.constant 4.471500e-02 : f32
    %155 = vector.broadcast %cst_41 : f32 to vector<16x128xf32>
    %156 = arith.mulf %155, %154 : vector<16x128xf32>
    %157 = arith.addf %149, %156 : vector<16x128xf32>
    %158 = vector.broadcast %152 : f32 to vector<16x128xf32>
    %159 = arith.mulf %158, %157 : vector<16x128xf32>
    %160 = math.tanh %159 : vector<16x128xf32>
    %cst_42 = arith.constant 1.000000e+00 : f32
    %161 = vector.broadcast %cst_42 : f32 to vector<16x128xf32>
    %162 = arith.addf %161, %160 : vector<16x128xf32>
    %163 = arith.mulf %151, %162 : vector<16x128xf32>
    %164 = arith.truncf %163 : vector<16x128xf32> to vector<16x128xbf16>
    %c0_43 = arith.constant 0 : index
    %c0_44 = arith.constant 0 : index
    %c0_45 = arith.constant 0 : index
    %165 = vector.load %arg6[%c0_43, %c0_44, %c0_45] : memref<1x128x32xbf16, #tpu.memory_space<vmem>>, vector<1x128x32xbf16>
    %166 = vector.shape_cast %165 : vector<1x128x32xbf16> to vector<128x32xbf16>
    %cst_46 = arith.constant dense<0.000000e+00> : vector<16x32xf32>
    %167 = tpu.matmul %164, %166, %cst_46 {dimension_numbers = #tpu.dot_dimension_numbers<[1], [0], [0], [1], [0, 0, 1, 1], [], []>} : vector<16x128xbf16>, vector<128x32xbf16>, vector<16x32xf32> -> vector<16x32xf32>
    %168 = vector.broadcast %13 : vector<1x32xf32> to vector<16x32xf32>
    %169 = arith.addf %167, %168 : vector<16x32xf32>
    %170 = arith.addf %119, %169 : vector<16x32xf32>
    %c0_47 = arith.constant 0 : index
    %c0_48 = arith.constant 0 : index
    %171 = vector.load %arg10[%c0_47, %c0_48] : memref<16x32xf32, #tpu.memory_space<vmem>>, vector<16x32xf32>
    tpu.vector_store %arg10[%c0_47, %c0_48], %170 {strides = array<i32>} : memref<16x32xf32, #tpu.memory_space<vmem>>, vector<16x32xf32>,
    %c1_i32 = arith.constant 1 : i32
    %172 = arith.cmpi eq, %arg0, %c1_i32 : i32
    %173 = arith.extui %172 : i1 to i32
    %c0_i32_49 = arith.constant 0 : i32
    %174 = arith.cmpi ne, %173, %c0_i32_49 : i32
    scf.if %174 {
      %c0_50 = arith.constant 0 : index
      %c0_51 = arith.constant 0 : index
      %175 = vector.load %arg7[%c0_50, %c0_51] : memref<1x32xf32, #tpu.memory_space<vmem>>, vector<1x32xf32>
      %c0_52 = arith.constant 0 : index
      %c0_53 = arith.constant 0 : index
      %176 = vector.load %arg8[%c0_52, %c0_53] : memref<1x32xf32, #tpu.memory_space<vmem>>, vector<1x32xf32>
      %cst_54 = arith.constant dense<0.000000e+00> : vector<16xf32>
      %177 = vector.multi_reduction <add>, %170, %cst_54 [1] : vector<16x32xf32> to vector<16xf32>
      %178 = vector.shape_cast %177 : vector<16xf32> to vector<16x1xf32>
      %cst_55 = arith.constant 3.200000e+01 : f32
      %179 = vector.broadcast %cst_55 : f32 to vector<16x1xf32>
      %180 = arith.divf %178, %179 : vector<16x1xf32>
      %181 = vector.broadcast %180 : vector<16x1xf32> to vector<16x32xf32>
      %182 = arith.subf %170, %181 : vector<16x32xf32>
      %183 = arith.mulf %182, %182 : vector<16x32xf32>
      %cst_56 = arith.constant dense<0.000000e+00> : vector<16xf32>
      %184 = vector.multi_reduction <add>, %183, %cst_56 [1] : vector<16x32xf32> to vector<16xf32>
      %185 = vector.shape_cast %184 : vector<16xf32> to vector<16x1xf32>
      %cst_57 = arith.constant 3.200000e+01 : f32
      %186 = vector.broadcast %cst_57 : f32 to vector<16x1xf32>
      %187 = arith.divf %185, %186 : vector<16x1xf32>
      %188 = vector.broadcast %180 : vector<16x1xf32> to vector<16x32xf32>
      %189 = arith.subf %170, %188 : vector<16x32xf32>
      %cst_58 = arith.constant 9.99999974E-6 : f32
      %190 = vector.broadcast %cst_58 : f32 to vector<16x1xf32>
      %191 = arith.addf %187, %190 : vector<16x1xf32>
      %192 = math.rsqrt %191 : vector<16x1xf32>
      %193 = vector.broadcast %192 : vector<16x1xf32> to vector<16x32xf32>
      %194 = arith.mulf %189, %193 : vector<16x32xf32>
      %195 = vector.broadcast %175 : vector<1x32xf32> to vector<16x32xf32>
      %196 = arith.mulf %194, %195 : vector<16x32xf32>
      %197 = vector.broadcast %176 : vector<1x32xf32> to vector<16x32xf32>
      %198 = arith.addf %196, %197 : vector<16x32xf32>
      %199 = arith.truncf %198 : vector<16x32xf32> to vector<16x32xbf16>
      %c0_59 = arith.constant 0 : index
      %c0_60 = arith.constant 0 : index
      %200 = vector.load %arg9[%c0_59, %c0_60] : memref<16x32xbf16, #tpu.memory_space<vmem>>, vector<16x32xbf16>
      tpu.vector_store %arg9[%c0_59, %c0_60], %199 {strides = array<i32>} : memref<16x32xbf16, #tpu.memory_space<vmem>>, vector<16x32xbf16>,
    } else {
    }
    return
  }
  func.func @transform_0(%arg0: i32) -> (i32, i32) {
    %c0_i32 = arith.constant 0 : i32
    %c0_i32_0 = arith.constant 0 : i32
    %c0_i32_1 = arith.constant 0 : i32
    return %c0_i32, %c0_i32_0 : i32, i32
  }
  func.func @transform_1(%arg0: i32) -> (i32, i32, i32, i32) {
    %c0_i32 = arith.constant 0 : i32
    %c0_i32_0 = arith.constant 0 : i32
    %c0_i32_1 = arith.constant 0 : i32
    %c0_i32_2 = arith.constant 0 : i32
    return %arg0, %c0_i32, %c0_i32_0, %c0_i32_1 : i32, i32, i32, i32
  }
  func.func @transform_2(%arg0: i32) -> (i32, i32, i32) {
    %c0_i32 = arith.constant 0 : i32
    %c0_i32_0 = arith.constant 0 : i32
    %c0_i32_1 = arith.constant 0 : i32
    return %arg0, %c0_i32, %c0_i32_0 : i32, i32, i32
  }
  func.func @transform_3(%arg0: i32) -> (i32, i32, i32) {
    %c0_i32 = arith.constant 0 : i32
    %c0_i32_0 = arith.constant 0 : i32
    %c0_i32_1 = arith.constant 0 : i32
    return %arg0, %c0_i32, %c0_i32_0 : i32, i32, i32
  }
  func.func @transform_4(%arg0: i32) -> (i32, i32, i32) {
    %c0_i32 = arith.constant 0 : i32
    %c0_i32_0 = arith.constant 0 : i32
    %c0_i32_1 = arith.constant 0 : i32
    return %arg0, %c0_i32, %c0_i32_0 : i32, i32, i32
  }
  func.func @transform_5(%arg0: i32) -> (i32, i32, i32) {
    %c0_i32 = arith.constant 0 : i32
    %c0_i32_0 = arith.constant 0 : i32
    %c0_i32_1 = arith.constant 0 : i32
    return %arg0, %c0_i32, %c0_i32_0 : i32, i32, i32
  }
  func.func @transform_6(%arg0: i32) -> (i32, i32) {
    %c0_i32 = arith.constant 0 : i32
    %c0_i32_0 = arith.constant 0 : i32
    %c0_i32_1 = arith.constant 0 : i32
    return %c0_i32, %c0_i32_0 : i32, i32
  }
  func.func @transform_7(%arg0: i32) -> (i32, i32) {
    %c0_i32 = arith.constant 0 : i32
    %c0_i32_0 = arith.constant 0 : i32
    %c0_i32_1 = arith.constant 0 : i32
    return %c0_i32, %c0_i32_0 : i32, i32
  }
  func.func @transform_8(%arg0: i32) -> (i32, i32) {
    %c0_i32 = arith.constant 0 : i32
    %c0_i32_0 = arith.constant 0 : i32
    %c0_i32_1 = arith.constant 0 : i32
    return %c0_i32, %c0_i32_0 : i32, i32
  }
}

</mosaic_0001>

<bundles_post_ra>
// kernel: gpt_forward_pallas.3
= control target key start
LH: loop header
LB: loop body
LE: loop exit
PB: predicated region body
PF: predicated region fallthrough
CT: control target
= control target key end

     0   :  { %v147_v1 = vmov 0.0   ;;  %vm148_vm0 = vmmov 0   ;;  %s188_s0 = inlined_call_operand.vmem [shape: bf16[16,32], index: 0, kind: input, shape index: {}]   ;;  %s189_s1 = inlined_call_operand.vmem [shape: bf16[32,64], index: 1, kind: input, shape index: {}]   ;;  %s190_s2 = inlined_call_operand.hbm [shape: f32[16,64], index: 2, kind: output, shape index: {}]  }
   0x1   :  { %v120_v0 = vld [vmem:[%s189_s1] sm:$0xff]   ;;  %107 = vmatprep.subr.bf16.mxu0 %v147_v1  ;;  %v121_v2 = vld [vmem:[%s189_s1 + $0x8] sm:$0xff]   ;;  %111 = vmatprep.mubr.msk.bf16.mxu0 %vm148_vm0, %v147_v1 }
   0x2   :  { %108 = vmatpush3.bf16.msra.mxu0 %v120_v0 }
   0x3   :  { %109 = vmatprep.subr.bf16.mxu0 %v147_v1 }
   0x4   :  { %7 = vsyncpa [#allocation3], 0  ;;  %v122_v3 = vld [vmem:[%s188_s0] sm:$0xff]   ;;  %vm36_vm1 = vcmask 261120   ;;  %s149_s15 = smov [#allocation2]   ;;  %vm81_vm2 = vcmask 523264  }
   0x5   :  { %s89_s16 = sshll.u32 %s149_s15, 4  ;;  %s90_s16 = int_to_ptr.vmem [resolvable:$true] %s89_s16 }
   0x6   :  { %110 = vmatpush3.bf16.msra.mxu0 %v121_v2  ;;  %s123_s1 = scalar_lea.vmem %s90_s16, 256  ;;  %p128_p1 = scmp.lt.s32.totalorder %s90_s16, %s90_s16 }
   0x7   :  { %p124_p0 = scmp.ne.s32.totalorder %s90_s16, %s123_s1  ;;  %p129_p2 = scmp.lt.s32.totalorder %s123_s1, %s123_s1 }
   0x9   :  { %112 = vmatmul.mubr.msk.bf16.vlgmr.msra.gmra.mrb[0].mxu0 %vm36_vm1, %v122_v3  ;;  %p130_p3 = por %p129_p2, %p128_p1 }
   0xb   :  { %p131_p4 = pnand %p130_p3, %p124_p0 }
  0xdc   :  { %v74_v4 = vpop.f32.mrb[0].mxu0 }
  0xdd   :  { %82 = vst.msk [vmem:[#allocation2] sm:$0xff] %vm81_vm2, %v74_v4  ;;  %v113_v5 = vpop.f32.mrb[1].mxu0 }
  0xde   :  { %v77_v6 = vpop.f32.mrb[2].mxu0 }
  0xdf   :  { %83 = vst.msk [vmem:[#allocation2 + $0x8] sm:$0xff] %vm81_vm2, %v77_v6  ;;  %v114_v7 = vpop.f32.mrb[3].mxu0 }
  0xe0   :  { %134 = shalt.err (!%p131_p4)
}
  0xe1   :  { %s135_s18 = scalar_lea.hbm %s190_s2, 256 }
  0xe2   :  { %p136_p5 = scmp.ne.s32.totalorder %s190_s2, %s135_s18  ;;  %p139_p6 = scmp.lt.u32.totalorder %s135_s18, %s190_s2 }
  0xe4   :  { %p141_p7 = pnand %p139_p6, %p136_p5 }
  0xe6   :  { %144 = shalt.err (!%p141_p7)
}
  0xe7   :  { %s150_s23 = smov 128   ;;  %s151_s24 = smov 8  }
  0xe8   :  { %95 = dma.vmem_to_hbm [thread:$0]  %s90_s16, 256, %s190_s2, [#allocation3], %s150_s23, %s150_s23, %s151_s24  }
  0xe9   :  { %145 = dma.done.wait [#allocation3], 256  }
  0xea   :  { %146 = vsyncadd [#allocation3], 4294967040 }
  0xeb   :  { %99 = vsyncpa [#allocation3], 1 }

// kernel: gpt_forward_pallas.2
= control target key start
LH: loop header
LB: loop body
LE: loop exit
PB: predicated region body
PF: predicated region fallthrough
CT: control target
= control target key end

     0   :  { %s3528_s27 = smov 0   ;;  %s4057_s0 = inlined_call_operand.vmem [shape: f32[16,32], index: 0, kind: input, shape index: {}]   ;;  %s4058_s1 = inlined_call_operand.vmem [shape: bf16[2,4,32,32], index: 1, kind: input, shape index: {}]   ;;  %s4059_s2 = inlined_call_operand.vmem [shape: f32[2,6,32], index: 2, kind: input, shape index: {}]   ;;  %s4060_s3 = inlined_call_operand.vmem [shape: bf16[2,32,128], index: 3, kind: input, shape index: {}]   ;;  %s4061_s4 = inlined_call_operand.vmem [shape: f32[2,1,128], index: 4, kind: input, shape index: {}]   ;;  %s4062_s5 = inlined_call_operand.vmem [shape: bf16[2,128,32], index: 5, kind: input, shape index: {}]   ;;  %s4063_s6 = inlined_call_operand.vmem [shape: f32[1,32], index: 6, kind: input, shape index: {}]   ;;  %s4064_s7 = inlined_call_operand.vmem [shape: f32[1,32], index: 7, kind: input, shape index: {}]   ;;  %s4065_s8 = inlined_call_operand.vmem [shape: bf16[16,32], index: 8, kind: output, shape index: {}]  }
   0x1 LB: > { %s3534_s28 = sadd.s32 4294967295, %s3471_s27   ;;  %p3074_p0 = scmp.ge.s32.totalorder %s3471_s27, 1  ;;  %s3471_s27 = sphi %s3528_s27, %s18_s27  }
   0x2   : > { %p294_p1 = scmp.lt.s32.totalorder %s3471_s27, 3 }
   0x4   : > { %p295_p2 = pnand %p3074_p0, %p294_p1 }
   0x5   : > { %p340_p3 = scmp.lt.s32.totalorder (!%p295_p2), %s3534_s28, 1  ;;  %p3082_p4 = scmp.ne.s32.totalorder (!%p295_p2), %s3534_s28, 0 }
   0x6   : > { %298 = sbr.rel (%p295_p2) target bundleno = 3516 (0xdbc), region = 52 }
   0xd   : > { %s3540_s29 = scalar_select %p340_p3, %s3534_s28, 1 }
   0xe   : > { %366 = sbr.rel (%p3082_p4) target bundleno = 21 (0x15), region = 56  ;;  %v367_v0 = vld [vmem:[%s4057_s0] sm:$0xff] (!%p3082_p4)  ;;  %vm369_vm0 = vcmask (!%p3082_p4), 261120   ;;  %v368_v1 = vld [vmem:[%s4057_s0 + $0x8] sm:$0xff] (!%p3082_p4) }
   0xf   : > { %s3146_s30 = sshll.u32 %s3540_s29, 6  ;;  %s3077_s9 = sshll.u32 %s3540_s29, 3  ;;  %370 = vst.msk [vmem:[#allocation2] sm:$0xff] (!%p3082_p4), %vm369_vm0, %v367_v0  ;;  %371 = vst.msk [vmem:[#allocation2 + $0x8] sm:$0xff] (!%p3082_p4), %vm369_vm0, %v368_v1 }
  0x10   : > { %s3547_s12 = scalar_lea.vmem %s4058_s1, %s3146_s30  ;;  %s3552_s15 = scalar_lea.vmem %s4059_s2, %s3077_s9 }
  0x11   : > { %s3147_s16 = sshll.u32 %s3540_s29, 4  ;;  %s356_s19 = scalar_lea.vmem %s4061_s4, %s3540_s29 }
  0x12   : > { %s3562_s22 = scalar_lea.vmem %s4060_s3, %s3147_s16  ;;  %s3567_s25 = scalar_lea.vmem %s4062_s5, %s3146_s30 }
  0x15 PF: > { %vm391_vm1 = vcmask 261120   ;;  %v3396_v16 = vld [vmem:[%s3547_s12] sm:$0xff]   ;;  %v3473_v17 = vmov 0.0   ;;  %v3397_v18 = vld [vmem:[%s3547_s12 + $0x8] sm:$0xff]   ;;  %vm3474_vm2 = vmmov 0   ;;  %v419_v23 = vlaneseq  ;;  %v3398_v40 = vld [vmem:[%s3547_s12 + $0x10] sm:$0xff]  }
  0x16   : > { %v372_v2 = vld [vmem:[#allocation2] sm:$0xff]  ;;  %v373_v3 = vld [vmem:[#allocation2 + $0x8] sm:$0xff]  ;;  %3207 = vmatprep.subr.bf16.mxu0 %v3473_v17  ;;  %3231 = vmatprep.subr.bf16.mxu1 %v3473_v17  ;;  %v3399_v42 = vld [vmem:[%s3547_s12 + $0x18] sm:$0xff]   ;;  %s3475_s30 = smov 112   ;;  %s3476_s13 = smov 120   ;;  %vm1050_vm3 = vcmask 64512  }
  0x17   : > { %v392_v4 = vsel %vm391_vm1, %v372_v2, 0.0  ;;  %v395_v5 = vsel %vm391_vm1, %v373_v3, 0.0  ;;  %3208 = vmatpush3.bf16.msra.mxu0 %v3396_v16  ;;  %3211 = vmatprep.mubr.msk.bf16.mxu0 %vm3474_vm2, %v3473_v17  ;;  %v3591_v26 = vshrl.u32 %v419_v23, 7  ;;  %v390_v28 = vld [vmem:[%s3552_s15] sm:$0x3f]  ;;  %v3401_v44 = vld [vmem:[%s3547_s12 + $0x28] sm:$0xff]  }
  0x18   : > { %393 = vadd.xlane.f32.xlu0 %v392_v4  ;;  %3209 = vmatprep.subr.bf16.mxu0 %v3473_v17  ;;  %v3400_v43 = vld [vmem:[%s3547_s12 + $0x20] sm:$0xff]   ;;  %s3477_s14 = smov 104   ;;  %v3478_v57 = vmov 1983009808   ;;  %v3479_v59 = vmov 1934713408  }
  0x19   : > { %3233 = vmatprep.mubr.msk.bf16.mxu1 %vm3474_vm2, %v3473_v17  ;;  %v421_v27 = vsub.s32 1, %v3591_v26  ;;  %v427_v32 = vsub.s32 2, %v3591_v26  ;;  %v613_v58 = vunpack.c.l.s4 %v3478_v57  ;;  %v645_v60 = vunpack.c.l.s4 %v3479_v59  ;;  %s3481_s16 = smov 8   ;;  %s3482_s17 = smov 24  }
  0x1a   : > { %vm1286_vm5 = vcmask 1043456   ;;  %vm1617_vm6 = vcmask 130048   ;;  %vm1619_vm7 = vcmask 195584   ;;  %p3139_p5 = scmp.ne.s32.totalorder %s3534_s28, 1 }
  0x1b   : > { %3210 = vmatpush3.bf16.msra.mxu0 %v3397_v18  ;;  %v422_v31 = vrot.slane %v390_v28, %v421_v27  ;;  %v428_v36 = vrot.slane %v390_v28, %v427_v32  ;;  %v614_v61 = vunpack.c.0.s8 %v613_v58  ;;  %v646_v63 = vunpack.c.0.s8 %v645_v60 }
  0x1c   : > { %396 = vadd.xlane.f32.xlu0 %v395_v5  ;;  %3215 = vmatprep.subr.bf16.mxu0 %v3473_v17  ;;  %vm2995_vm8 = vcmask (!%p3139_p5), 257024  }
  0x1d   : > { %v3633_v0 = vsub.s32 %v614_v61, %v3591_v26 }
  0xa5   : > { %v394_v6 = vpop.xlane.xlu0 %393 }
  0xa6   : > { %v399_v7 = vmul.f32 0.03125, %v394_v6 }
  0xa8   : > { %v401_v8 = vsub.f32 %v372_v2, %v399_v7  ;;  %v3636_v7 = vsub.s32 %v646_v63, %v3591_v26 }
  0xa9   : > { %v397_v9 = vpop.xlane.xlu0 %396 }
  0xaa   : > { %v400_v10 = vmul.f32 0.03125, %v397_v9  ;;  %v403_v11 = vmul.f32 %v401_v8, %v401_v8 }
  0xac   : > { %v402_v12 = vsub.f32 %v373_v3, %v400_v10  ;;  %v405_v13 = vsel %vm391_vm1, %v403_v11, 0.0 }
  0xad   : > { %406 = vadd.xlane.f32.xlu1 %v405_v13 }
  0xae   : > { %v404_v14 = vmul.f32 %v402_v12, %v402_v12 }
  0xb0   : > { %v408_v15 = vsel %vm391_vm1, %v404_v14, 0.0 }
  0xb1   : > { %409 = vadd.xlane.f32.xlu1 %v408_v15 }
 0x13a   : > { %v407_v19 = vpop.xlane.xlu1 %406 }
 0x13b   : > { %v411_v20 = vmul.f32 0.03125, %v407_v19 }
 0x13d   : > { %v413_v21 = vadd.f32 1e-05, %v411_v20 }
 0x13e   : > { %v410_v22 = vpop.xlane.xlu1 %409 }
 0x13f   : > { %3414 = vrsqrt.f32 %v413_v21  ;;  %v412_v24 = vmul.f32 0.03125, %v410_v22 }
 0x141   : > { %v414_v25 = vadd.f32 1e-05, %v412_v24 }
 0x143   : > { %3416 = vrsqrt.f32 %v414_v25 }
 0x149   : > { %v3415_v29 = vpop.eup %3414 }
 0x14a   : > { %v417_v30 = vmul.f32 %v3415_v29, %v401_v8 }
 0x14c   : > { %v423_v35 = vmul.f32 %v422_v31, %v417_v30 }
 0x14d   : > { %v3417_v33 = vpop.eup %3416 }
 0x14e   : > { %v418_v34 = vmul.f32 %v3417_v33, %v402_v12  ;;  %v429_v38 = vadd.f32 %v428_v36, %v423_v35 }
 0x150   : > { %v424_v37 = vmul.f32 %v422_v31, %v418_v34 }
 0x152   : > { %v430_v39 = vadd.f32 %v428_v36, %v424_v37 }
 0x154   : > { %v431_v41 = vpack.c.bf16 %v430_v39, %v429_v38 }
 0x156   : > { %3212 = vmatmul.mubr.msk.bf16.vlgmr.msra.gmra.mrb[0].mxu0 %vm391_vm1, %v431_v41 }
 0x157   : > { %3216 = vmatpush3.bf16.msra.mxu0 %v3398_v40  ;;  %3219 = vmatprep.mubr.msk.bf16.mxu0 %vm3474_vm2, %v3473_v17 }
 0x158   : > { %3217 = vmatprep.subr.bf16.mxu0 %v3473_v17 }
 0x15b   : > { %3218 = vmatpush3.bf16.msra.mxu0 %v3399_v42 }
 0x15c   : > { %3223 = vmatprep.subr.bf16.mxu0 %v3473_v17 }
 0x15e   : > { %3220 = vmatmul.mubr.msk.bf16.vlgmr.msra.gmra.mrb[4].mxu0 %vm391_vm1, %v431_v41 }
 0x15f   : > { %3224 = vmatpush3.bf16.msra.mxu0 %v3400_v43  ;;  %3227 = vmatprep.mubr.msk.bf16.mxu0 %vm3474_vm2, %v3473_v17 }
 0x160   : > { %3225 = vmatprep.subr.bf16.mxu0 %v3473_v17 }
 0x163   : > { %3226 = vmatpush3.bf16.msra.mxu0 %v3401_v44 }
 0x164   : > { %3237 = vmatprep.subr.bf16.mxu0 %v3473_v17 }
 0x166   : > { %3228 = vmatmul.mubr.msk.bf16.vlgmr.msra.gmra.mrb[8].mxu0 %vm391_vm1, %v431_v41 }
 0x167   : > { %3239 = vmatprep.mubr.msk.bf16.mxu0 %vm3474_vm2, %v3473_v17 }
 0x229   : > { %v3613_v45 = vpop.f32.mrb[0].mxu0 }
 0x22a   : > { %v3213_v46 = vpop.f32.mrb[1].mxu0 }
 0x22b   : > { %v3615_v47 = vpop.f32.mrb[2].mxu0 }
 0x22c   : > { %v3214_v48 = vpop.f32.mrb[3].mxu0 }
 0x231   : > { %v534_v49 = vpop.f32.mrb[4].mxu0 }
 0x232   : > { %754 = vrot.lane.b32.xlu1 %v534_v49, %s3475_s30  ;;  %751 = vrot.lane.b32.xlu0 %v534_v49, %s3476_s13  ;;  %v3221_v50 = vpop.f32.mrb[5].mxu0 }
 0x233   : > { %v3619_v51 = vpop.f32.mrb[6].mxu0 }
 0x234   : > { %v3222_v52 = vpop.f32.mrb[7].mxu0 }
 0x236   : > { %757 = vrot.lane.b32.xlu1 %v534_v49, %s3477_s14  ;;  %604 = vrot.lane.b32.xlu0 %v3613_v45, %s3475_s30 }
 0x239   : > { %v3624_v53 = vpop.f32.mrb[8].mxu0 }
 0x23a   : > { %601 = vrot.lane.b32.xlu1 %v3613_v45, %s3476_s13  ;;  %v3229_v54 = vpop.f32.mrb[9].mxu0 }
 0x23b   : > { %v3628_v55 = vpop.f32.mrb[10].mxu0 }
 0x23c   : > { %v3230_v56 = vpop.f32.mrb[11].mxu0 }
 0x23e   : > { %607 = vrot.lane.b32.xlu1 %v3613_v45, %s3477_s14 }
 0x2a4   : > { %v755_v62 = vpop.permute.xlu1 %754  ;;  %v752_v3 = vpop.permute.xlu0 %751 }
 0x2a5   : > { %v760_v1 = vcombine.low %v534_v49, %v755_v62  ;;  %v761_v2 = vcombine.high %v534_v49, %v755_v62 }
 0x2a7   : > { %v768_v8 = vrot.slane %v760_v1, %v3633_v0  ;;  %v775_v9 = vrot.slane %v761_v2, %v3633_v0 }
 0x2a8   : > { %v758_v4 = vpop.permute.xlu1 %757  ;;  %v605_v18 = vpop.permute.xlu0 %604 }
 0x2a9   : > { %v776_v5 = vcombine.low %v752_v3, %v758_v4  ;;  %v777_v6 = vcombine.high %v752_v3, %v758_v4  ;;  %v610_v24 = vcombine.low %v3613_v45, %v605_v18  ;;  %v611_v25 = vcombine.high %v3613_v45, %v605_v18 }
 0x2ab   : > { %v784_v10 = vrot.slane %v776_v5, %v3633_v0  ;;  %v791_v11 = vrot.slane %v777_v6, %v3633_v0  ;;  %v618_v38 = vrot.slane %v610_v24, %v3633_v0  ;;  %v625_v39 = vrot.slane %v611_v25, %v3633_v0 }
 0x2ac   : > { %v602_v12 = vpop.permute.xlu1 %601 }
 0x2ad   : > { %v792_v13 = vcombine.low %v768_v8, %v784_v10  ;;  %v793_v14 = vcombine.high %v768_v8, %v784_v10  ;;  %v808_v15 = vcombine.low %v775_v9, %v791_v11  ;;  %v809_v16 = vcombine.high %v775_v9, %v791_v11 }
 0x2af   : > { %v800_v19 = vrot.slane %v792_v13, %v3636_v7  ;;  %v807_v20 = vrot.slane %v793_v14, %v3636_v7  ;;  %v816_v21 = vrot.slane %v808_v15, %v3636_v7  ;;  %v823_v22 = vrot.slane %v809_v16, %v3636_v7 }
 0x2b0   : > { %v608_v27 = vpop.permute.xlu1 %607 }
 0x2b1   : > { %v828_v28 = vcombine.low %v800_v19, %v807_v20  ;;  %v3094_v29 = vcombine.high %v800_v19, %v807_v20  ;;  %v844_v30 = vcombine.low %v816_v21, %v823_v22  ;;  %v3095_v31 = vcombine.high %v816_v21, %v823_v22 }
 0x2b2   : > { %v626_v32 = vcombine.low %v602_v12, %v608_v27  ;;  %v627_v33 = vcombine.high %v602_v12, %v608_v27 }
 0x2b3   : > { %v835_v34 = vrot.slane %v828_v28, %v3633_v0  ;;  %v843_v35 = vrot.slane %v3094_v29, %v3633_v0  ;;  %v851_v36 = vrot.slane %v844_v30, %v3633_v0  ;;  %v859_v37 = vrot.slane %v3095_v31, %v3633_v0 }
 0x2b4   : > { %v634_v40 = vrot.slane %v626_v32, %v3633_v0  ;;  %v641_v41 = vrot.slane %v627_v33, %v3633_v0 }
 0x2b5   : > { %v860_v42 = vcombine.low %v835_v34, %v843_v35  ;;  %v876_v43 = vcombine.low %v851_v36, %v859_v37  ;;  %v861_v52 = vcombine.high %v835_v34, %v843_v35  ;;  %v877_v54 = vcombine.high %v851_v36, %v859_v37 }
 0x2b6   : > { %v642_v44 = vcombine.low %v618_v38, %v634_v40  ;;  %v643_v45 = vcombine.high %v618_v38, %v634_v40  ;;  %v658_v46 = vcombine.low %v625_v39, %v641_v41  ;;  %v659_v48 = vcombine.high %v625_v39, %v641_v41 }
 0x2b7   : > { %v868_v49 = vrot.slane %v860_v42, %v3636_v7  ;;  %v884_v50 = vrot.slane %v876_v43, %v3636_v7  ;;  %v875_v5 = vrot.slane %v861_v52, %v3636_v7  ;;  %v891_v6 = vrot.slane %v877_v54, %v3636_v7 }
 0x2b8   : > { %v650_v56 = vrot.slane %v642_v44, %v3636_v7  ;;  %v657_v57 = vrot.slane %v643_v45, %v3636_v7  ;;  %v666_v58 = vrot.slane %v658_v46, %v3636_v7  ;;  %v673_v59 = vrot.slane %v659_v48, %v3636_v7 }
 0x2b9   : > { %v892_v60 = vcombine.low %v868_v49, %v884_v50  ;;  %v893_v61 = vcombine.high %v868_v49, %v884_v50  ;;  %v894_v16 = vcombine.low %v875_v5, %v891_v6  ;;  %v895_v18 = vcombine.high %v875_v5, %v891_v6 }
 0x2ba   : > { %v678_v62 = vcombine.low %v650_v56, %v657_v57  ;;  %v3092_v63 = vcombine.high %v650_v56, %v657_v57  ;;  %v694_v1 = vcombine.low %v666_v58, %v673_v59  ;;  %v3093_v2 = vcombine.high %v666_v58, %v673_v59 }
 0x2bb   : > { %v896_v3 = vpack.c.bf16 %v892_v60, %v892_v60  ;;  %v897_v4 = vpack.c.bf16 %v893_v61, %v893_v61  ;;  %v898_v27 = vpack.c.bf16 %v894_v16, %v894_v16  ;;  %v899_v28 = vpack.c.bf16 %v895_v18, %v895_v18 }
 0x2bc   : > { %v685_v8 = vrot.slane %v678_v62, %v3633_v0  ;;  %v693_v9 = vrot.slane %v3092_v63, %v3633_v0  ;;  %v701_v10 = vrot.slane %v694_v1, %v3633_v0  ;;  %v709_v11 = vrot.slane %v3093_v2, %v3633_v0 }
 0x2bd   : > { %v1055_v12 = vsel %vm1050_vm3, %v896_v3, 0  ;;  %v1101_v13 = vsel %vm1050_vm3, %v897_v4, 0  ;;  %v1147_v33 = vsel %vm1050_vm3, %v898_v27, 0  ;;  %v1193_v34 = vsel %vm1050_vm3, %v899_v28, 0 }
 0x2be   : > { %3232 = vmatpush3.bf16.xpose.msra.mxu1 %v1055_v12  ;;  %3238 = vmatpush3.bf16.xpose.msra.mxu0 %v1101_v13  ;;  %v710_v14 = vcombine.low %v685_v8, %v693_v9  ;;  %v726_v15 = vcombine.low %v701_v10, %v709_v11  ;;  %v711_v20 = vcombine.high %v685_v8, %v693_v9  ;;  %v597_v39 = vand.u32 127, %v419_v23 }
 0x2bf   : > { %3243 = vmatprep.subr.bf16.mxu1 %v3473_v17  ;;  %3249 = vmatprep.subr.bf16.mxu0 %v3473_v17  ;;  %v727_v21 = vcombine.high %v701_v10, %v709_v11 }
 0x2c0   : > { %v718_v19 = vrot.slane %v710_v14, %v3636_v7  ;;  %v734_v22 = vrot.slane %v726_v15, %v3636_v7  ;;  %v725_v31 = vrot.slane %v711_v20, %v3636_v7  ;;  %vm598_vm4 = vcmp.gt.s32.totalorder %v597_v39, %v3591_v26 }
 0x2c1   : > { %v741_v32 = vrot.slane %v727_v21, %v3636_v7  ;;  %v3695_v40 = vsel %vm598_vm4, -1e+30, %v3473_v17 }
 0x2c2   : > { %v742_v24 = vcombine.low %v718_v19, %v734_v22  ;;  %v743_v25 = vcombine.high %v718_v19, %v734_v22 }
 0x2c3   : > { %v744_v35 = vcombine.low %v725_v31, %v741_v32  ;;  %v745_v36 = vcombine.high %v725_v31, %v741_v32 }
 0x2c4   : > { %v746_v29 = vpack.c.bf16 %v742_v24, %v742_v24  ;;  %v747_v30 = vpack.c.bf16 %v743_v25, %v743_v25 }
 0x2c5   : > { %v748_v37 = vpack.c.bf16 %v744_v35, %v744_v35  ;;  %v749_v38 = vpack.c.bf16 %v745_v36, %v745_v36 }
 0x2c6   : > { %3234 = vmatmul.mubr.msk.bf16.vlgmr.msra.gmra.mrb[0].mxu1 %vm1050_vm3, %v746_v29  ;;  %3240 = vmatmul.mubr.msk.bf16.vlgmr.msra.gmra.mrb[12].mxu0 %vm1050_vm3, %v747_v30 }
 0x2c7   : > { %3244 = vmatpush3.bf16.xpose.msra.mxu1 %v1147_v33  ;;  %3250 = vmatpush3.bf16.xpose.msra.mxu0 %v1193_v34 }
 0x2c8   : > { %3245 = vmatprep.mubr.msk.bf16.mxu1 %vm3474_vm2, %v3473_v17  ;;  %3251 = vmatprep.mubr.msk.bf16.mxu0 %vm3474_vm2, %v3473_v17 }
 0x2c9   : > { %3255 = vmatprep.subr.bf16.mxu1 %v3473_v17  ;;  %3261 = vmatprep.subr.bf16.mxu0 %v3473_v17 }
 0x2ce   : > { %3246 = vmatmul.mubr.msk.bf16.vlgmr.msra.gmra.mrb[4].mxu1 %vm1050_vm3, %v748_v37  ;;  %3252 = vmatmul.mubr.msk.bf16.vlgmr.msra.gmra.mrb[16].mxu0 %vm1050_vm3, %v749_v38 }
 0x2cf   : > { %3257 = vmatprep.mubr.msk.bf16.mxu1 %vm3474_vm2, %v3473_v17  ;;  %3263 = vmatprep.mubr.msk.bf16.mxu0 %vm3474_vm2, %v3473_v17 }
 0x399   : > { %v1091_v41 = vpop.f32.mrb[0].mxu1  ;;  %v1137_v42 = vpop.f32.mrb[12].mxu0 }
 0x39a   : > { %v1092_v43 = vadd.f32 %v1091_v41, %v3695_v40  ;;  %v1138_v44 = vadd.f32 %v1137_v42, %v3695_v40  ;;  %v3235_v45 = vpop.f32.mrb[1].mxu1  ;;  %v3241_v46 = vpop.f32.mrb[13].mxu0 }
 0x39b   : > { %v1094_v48 = vpop.f32.mrb[2].mxu1  ;;  %v1140_v49 = vpop.f32.mrb[14].mxu0 }
 0x39c   : > { %v3236_v50 = vpop.f32.mrb[3].mxu1  ;;  %v3242_v52 = vpop.f32.mrb[15].mxu0  ;;  %v1235_v54 = vsel %vm1050_vm3, %v1092_v43, -inf  ;;  %v1238_v23 = vsel %vm1050_vm3, %v1138_v44, -inf }
 0x39d   : > { %1236 = vmax.xlane.f32.xlu0 %v1235_v54  ;;  %1239 = vmax.xlane.f32.xlu1 %v1238_v23 }
 0x3a1   : > { %v1183_v56 = vpop.f32.mrb[4].mxu1  ;;  %v1229_v57 = vpop.f32.mrb[16].mxu0 }
 0x3a2   : > { %v1184_v58 = vadd.f32 %v1183_v56, %v3695_v40  ;;  %v3247_v59 = vpop.f32.mrb[5].mxu1  ;;  %v3253_v60 = vpop.f32.mrb[17].mxu0  ;;  %v1230_v63 = vadd.f32 %v1229_v57, %v3695_v40 }
 0x3a3   : > { %v1186_v61 = vpop.f32.mrb[6].mxu1  ;;  %v1232_v62 = vpop.f32.mrb[18].mxu0 }
 0x3a4   : > { %v3248_v1 = vpop.f32.mrb[7].mxu1  ;;  %v3254_v2 = vpop.f32.mrb[19].mxu0  ;;  %v1241_v3 = vsel %vm1050_vm3, %v1184_v58, -inf  ;;  %v1244_v4 = vsel %vm1050_vm3, %v1230_v63, -inf }
 0x3a5   : > { %1242 = vmax.xlane.f32.xlu0 %v1241_v3 }
 0x3a9   : > { %1245 = vmax.xlane.f32.xlu0 %v1244_v4 }
 0x3ae   : > { %904 = vrot.lane.b32.xlu1 %v3624_v53, %s3475_s30 }
 0x3b2   : > { %907 = vrot.lane.b32.xlu1 %v3624_v53, %s3477_s14 }
 0x3b6   : > { %1775 = vrot.lane.b32.xlu1 %v3619_v51, %s3475_s30 }
 0x3ba   : > { %1778 = vrot.lane.b32.xlu1 %v3619_v51, %s3477_s14 }
 0x3bf   : > { %901 = vrot.lane.b32.xlu0 %v3624_v53, %s3476_s13 }
 0x3c3   : > { %1772 = vrot.lane.b32.xlu0 %v3619_v51, %s3476_s13 }
 0x3c7   : > { %1622 = vrot.lane.b32.xlu0 %v3615_v47, %s3476_s13 }
 0x42a   : > { %v1237_v5 = vpop.xlane.xlu0 %1236  ;;  %v1240_v6 = vpop.xlane.xlu1 %1239 }
 0x42b   : > { %v1247_v8 = vsub.f32 %v1092_v43, %v1237_v5  ;;  %v1248_v9 = vsub.f32 %v1138_v44, %v1240_v6 }
 0x42d   : > { %v1251_v10 = vmul.f32 1.442695, %v1247_v8  ;;  %v1253_v11 = vmul.f32 1.442695, %v1248_v9 }
 0x42e   : > { %v905_v14 = vpop.permute.xlu1 %904 }
 0x42f   : > { %3418 = vpow2.f32 %v1251_v10  ;;  %v910_v20 = vcombine.low %v3624_v53, %v905_v14  ;;  %v911_v21 = vcombine.high %v3624_v53, %v905_v14 }
 0x430   : > { %3420 = vpow2.f32 %v1253_v11 }
 0x431   : > { %v918_v32 = vrot.slane %v910_v20, %v3633_v0  ;;  %v925_v53 = vrot.slane %v911_v21, %v3633_v0 }
 0x432   : > { %v1243_v12 = vpop.xlane.xlu0 %1242  ;;  %v908_v25 = vpop.permute.xlu1 %907 }
 0x433   : > { %v1249_v13 = vsub.f32 %v1184_v58, %v1243_v12 }
 0x435   : > { %v1255_v15 = vmul.f32 1.442695, %v1249_v13 }
 0x436   : > { %v1246_v16 = vpop.xlane.xlu0 %1245  ;;  %v1776_v13 = vpop.permute.xlu1 %1775 }
 0x437   : > { %3422 = vpow2.f32 %v1255_v15  ;;  %v1250_v18 = vsub.f32 %v1230_v63, %v1246_v16  ;;  %v1781_v20 = vcombine.low %v3619_v51, %v1776_v13  ;;  %v1782_v21 = vcombine.high %v3619_v51, %v1776_v13 }
 0x439   : > { %v3719_v19 = vpop.eup %3418  ;;  %v1257_v22 = vmul.f32 1.442695, %v1250_v18 }
 0x43a   : > { %v3723_v24 = vpop.eup %3420  ;;  %v902_v27 = vpop.permute.xlu0 %901  ;;  %v1259_v28 = vsel %vm1050_vm3, %v3719_v19, 0.0 }
 0x43b   : > { %3424 = vpow2.f32 %v1257_v22  ;;  %v926_v29 = vcombine.low %v902_v27, %v908_v25  ;;  %v927_v30 = vcombine.high %v902_v27, %v908_v25  ;;  %v1262_v31 = vsel %vm1050_vm3, %v3723_v24, 0.0  ;;  %1260 = vadd.xlane.f32.xlu0 %v1259_v28  ;;  %v1779_v15 = vpop.permute.xlu1 %1778 }
 0x43c   : > { %1263 = vadd.xlane.f32.xlu1 %v1262_v31  ;;  %v1789_v27 = vrot.slane %v1781_v20, %v3633_v0  ;;  %v1796_v28 = vrot.slane %v1782_v21, %v3633_v0 }
 0x43d   : > { %v934_v33 = vrot.slane %v926_v29, %v3633_v0  ;;  %v941_v34 = vrot.slane %v927_v30, %v3633_v0 }
 0x43e   : > { %v1773_v14 = vpop.permute.xlu0 %1772 }
 0x43f   : > { %v942_v35 = vcombine.low %v918_v32, %v934_v33  ;;  %v943_v36 = vcombine.high %v918_v32, %v934_v33  ;;  %v958_v37 = vcombine.low %v925_v53, %v941_v34  ;;  %v959_v38 = vcombine.high %v925_v53, %v941_v34 }
 0x440   : > { %v1797_v16 = vcombine.low %v1773_v14, %v1779_v15  ;;  %v1798_v18 = vcombine.high %v1773_v14, %v1779_v15 }
 0x441   : > { %v3733_v39 = vpop.eup %3422  ;;  %v950_v41 = vrot.slane %v942_v35, %v3636_v7  ;;  %v957_v42 = vrot.slane %v943_v36, %v3636_v7  ;;  %v966_v43 = vrot.slane %v958_v37, %v3636_v7  ;;  %v973_v44 = vrot.slane %v959_v38, %v3636_v7 }
 0x442   : > { %v1265_v45 = vsel %vm1050_vm3, %v3733_v39, 0.0  ;;  %v1805_v22 = vrot.slane %v1797_v16, %v3633_v0  ;;  %v1812_v25 = vrot.slane %v1798_v18, %v3633_v0  ;;  %v1623_v34 = vpop.permute.xlu0 %1622 }
 0x443   : > { %v978_v46 = vcombine.low %v950_v41, %v957_v42  ;;  %v3096_v48 = vcombine.high %v950_v41, %v957_v42  ;;  %v994_v49 = vcombine.low %v966_v43, %v973_v44  ;;  %v3097_v50 = vcombine.high %v966_v43, %v973_v44  ;;  %1266 = vadd.xlane.f32.xlu1 %v1265_v45 }
 0x444   : > { %v1813_v29 = vcombine.low %v1789_v27, %v1805_v22  ;;  %v1814_v30 = vcombine.high %v1789_v27, %v1805_v22  ;;  %v1829_v31 = vcombine.low %v1796_v28, %v1812_v25  ;;  %v1830_v32 = vcombine.high %v1796_v28, %v1812_v25 }
 0x445   : > { %v3741_v52 = vpop.eup %3424  ;;  %v985_v54 = vrot.slane %v978_v46, %v3633_v0  ;;  %v993_v23 = vrot.slane %v3096_v48, %v3633_v0  ;;  %v1001_v56 = vrot.slane %v994_v49, %v3633_v0  ;;  %v1009_v57 = vrot.slane %v3097_v50, %v3633_v0 }
 0x446   : > { %v1268_v58 = vsel %vm1050_vm3, %v3741_v52, 0.0  ;;  %v1821_v53 = vrot.slane %v1813_v29, %v3636_v7  ;;  %v1828_v33 = vrot.slane %v1814_v30, %v3636_v7  ;;  %v1837_v35 = vrot.slane %v1829_v31, %v3636_v7 }
 0x447   : > { %v1010_v59 = vcombine.low %v985_v54, %v993_v23  ;;  %v1026_v60 = vcombine.low %v1001_v56, %v1009_v57  ;;  %v1011_v61 = vcombine.high %v985_v54, %v993_v23  ;;  %1269 = vadd.xlane.f32.xlu0 %v1268_v58  ;;  %v1027_v2 = vcombine.high %v1001_v56, %v1009_v57 }
 0x448   : > { %v1844_v51 = vrot.slane %v1830_v32, %v3636_v7  ;;  %v1849_v36 = vcombine.low %v1821_v53, %v1828_v33  ;;  %v3110_v38 = vcombine.high %v1821_v53, %v1828_v33 }
 0x449   : > { %v1018_v62 = vrot.slane %v1010_v59, %v3636_v7  ;;  %v1034_v63 = vrot.slane %v1026_v60, %v3636_v7  ;;  %v1025_v1 = vrot.slane %v1011_v61, %v3636_v7  ;;  %v1041_v5 = vrot.slane %v1027_v2, %v3636_v7 }
 0x44a   : > { %v1865_v41 = vcombine.low %v1837_v35, %v1844_v51  ;;  %v3111_v42 = vcombine.high %v1837_v35, %v1844_v51  ;;  %v1856_v44 = vrot.slane %v1849_v36, %v3633_v0  ;;  %v1864_v45 = vrot.slane %v3110_v38, %v3633_v0 }
 0x44b   : > { %v1042_v3 = vcombine.low %v1018_v62, %v1034_v63  ;;  %v1043_v4 = vcombine.high %v1018_v62, %v1034_v63  ;;  %v3753_v9 = vcombine.low %v1025_v1, %v1041_v5  ;;  %v3755_v10 = vcombine.high %v1025_v1, %v1041_v5 }
 0x44c   : > { %v1872_v46 = vrot.slane %v1865_v41, %v3633_v0  ;;  %v1880_v48 = vrot.slane %v3111_v42, %v3633_v0  ;;  %v1881_v50 = vcombine.low %v1856_v44, %v1864_v45 }
 0x44d   : > { %v1046_v6 = vpack.c.bf16 %v1042_v3, %v1042_v3  ;;  %v1047_v8 = vpack.c.bf16 %v1043_v4, %v1043_v4  ;;  %v1048_v59 = vpack.c.bf16 %v3753_v9, %v3753_v9  ;;  %v1049_v62 = vpack.c.bf16 %v3755_v10, %v3755_v10 }
 0x44e   : > { %v1897_v54 = vcombine.low %v1872_v46, %v1880_v48  ;;  %v1889_v63 = vrot.slane %v1881_v50, %v3636_v7  ;;  %v1898_v21 = vcombine.high %v1872_v46, %v1880_v48 }
 0x44f   : > { %v1288_v11 = vsel %vm1286_vm5, %v1046_v6, 0  ;;  %v1334_v12 = vsel %vm1286_vm5, %v1047_v8, 0  ;;  %v1380_v5 = vsel %vm1286_vm5, %v1048_v59, 0 }
 0x450   : > { %3256 = vmatpush3.bf16.msra.mxu1 %v1288_v11  ;;  %3262 = vmatpush3.bf16.msra.mxu0 %v1334_v12  ;;  %v1905_v1 = vrot.slane %v1897_v54, %v3636_v7  ;;  %v1882_v12 = vcombine.high %v1856_v44, %v1864_v45  ;;  %v1912_v36 = vrot.slane %v1898_v21, %v3636_v7 }
 0x451   : > { %3267 = vmatprep.subr.bf16.mxu1 %v3473_v17  ;;  %3273 = vmatprep.subr.bf16.mxu0 %v3473_v17 }
 0x452   : > { %v1913_v8 = vcombine.low %v1889_v63, %v1905_v1  ;;  %v1914_v20 = vcombine.high %v1889_v63, %v1905_v1  ;;  %v1896_v30 = vrot.slane %v1882_v12, %v3636_v7 }
 0x454   : > { %1625 = vrot.lane.b32.xlu1 %v3615_v47, %s3475_s30  ;;  %v1917_v18 = vpack.c.bf16 %v1913_v8, %v1913_v8  ;;  %v1918_v51 = vpack.c.bf16 %v1914_v20, %v1914_v20  ;;  %v1915_v54 = vcombine.low %v1896_v30, %v1912_v36 }
 0x456   : > { %v2075_v35 = vsel %vm1050_vm3, %v1917_v18, 0  ;;  %v2121_v48 = vsel %vm1050_vm3, %v1918_v51, 0 }
 0x45d   : > { %1628 = vrot.lane.b32.xlu0 %v3615_v47, %s3477_s14 }
 0x4c8   : > { %v1261_v37 = vpop.xlane.xlu0 %1260 }
 0x4c9   : > { %v1264_v43 = vpop.xlane.xlu1 %1263  ;;  %3426 = vrcp.f32 %v1261_v37 }
 0x4ca   : > { %3428 = vrcp.f32 %v1264_v43 }
 0x4d0   : > { %v1267_v49 = vpop.xlane.xlu1 %1266 }
 0x4d1   : > { %3430 = vrcp.f32 %v1267_v49 }
 0x4d3   : > { %v3427_v23 = vpop.eup %3426 }
 0x4d4   : > { %v3429_v56 = vpop.eup %3428  ;;  %v1275_v57 = vmul.f32 %v3427_v23, %v3719_v19  ;;  %v1626_v58 = vpop.permute.xlu1 %1625  ;;  %v1916_v23 = vcombine.high %v1896_v30, %v1912_v36 }
 0x4d5   : > { %v1276_v60 = vmul.f32 %v3429_v56, %v3723_v24  ;;  %v1270_v61 = vpop.xlane.xlu0 %1269  ;;  %v1631_v3 = vcombine.low %v3615_v47, %v1626_v58  ;;  %v1632_v19 = vcombine.high %v3615_v47, %v1626_v58  ;;  %v1426_v24 = vsel %vm1286_vm5, %v1049_v62, 0 }
 0x4d6   : > { %3432 = vrcp.f32 %v1270_v61  ;;  %v1279_v2 = vpack.c.bf16 %v1275_v57, %v1275_v57  ;;  %v1919_v62 = vpack.c.bf16 %v1915_v54, %v1915_v54  ;;  %v1920_v63 = vpack.c.bf16 %v1916_v23, %v1916_v23 }
 0x4d7   : > { %v1280_v4 = vpack.c.bf16 %v1276_v60, %v1276_v60  ;;  %v1639_v47 = vrot.slane %v1631_v3, %v3633_v0  ;;  %v1646_v14 = vrot.slane %v1632_v19, %v3633_v0 }
 0x4d8   : > { %3258 = vmatmul.mubr.msk.bf16.vlgmr.msra.gmra.mrb[8].mxu1 %vm1050_vm3, %v1279_v2  ;;  %v2167_v19 = vsel %vm1050_vm3, %v1919_v62, 0 }
 0x4d9   : > { %3264 = vmatmul.mubr.msk.bf16.vlgmr.msra.gmra.mrb[20].mxu0 %vm1050_vm3, %v1280_v4  ;;  %3268 = vmatpush3.bf16.msra.mxu1 %v1380_v5  ;;  %v1629_v6 = vpop.permute.xlu0 %1628  ;;  %v2213_v5 = vsel %vm1050_vm3, %v1920_v63, 0 }
 0x4da   : > { %3274 = vmatpush3.bf16.msra.mxu0 %v1426_v24  ;;  %v1647_v9 = vcombine.low %v1623_v34, %v1629_v6  ;;  %v1648_v10 = vcombine.high %v1623_v34, %v1629_v6  ;;  %3269 = vmatprep.mubr.msk.bf16.mxu1 %vm3474_vm2, %v3473_v17 }
 0x4db   : > { %v3431_v11 = vpop.eup %3430  ;;  %3279 = vmatprep.subr.bf16.mxu1 %v3473_v17  ;;  %3275 = vmatprep.mubr.msk.bf16.mxu0 %vm3474_vm2, %v3473_v17 }
 0x4dc   : > { %v1277_v13 = vmul.f32 %v3431_v11, %v3733_v39  ;;  %v1655_v15 = vrot.slane %v1647_v9, %v3633_v0  ;;  %v1662_v16 = vrot.slane %v1648_v10, %v3633_v0  ;;  %3285 = vmatprep.subr.bf16.mxu0 %v3473_v17 }
 0x4de   : > { %v1663_v22 = vcombine.low %v1639_v47, %v1655_v15  ;;  %v1664_v25 = vcombine.high %v1639_v47, %v1655_v15  ;;  %v1679_v27 = vcombine.low %v1646_v14, %v1662_v16  ;;  %v1680_v28 = vcombine.high %v1646_v14, %v1662_v16 }
 0x4df   : > { %v1281_v29 = vpack.c.bf16 %v1277_v13, %v1277_v13 }
 0x4e0   : > { %v3433_v31 = vpop.eup %3432  ;;  %v1671_v39 = vrot.slane %v1663_v22, %v3636_v7  ;;  %v1678_v32 = vrot.slane %v1664_v25, %v3636_v7  ;;  %v1687_v53 = vrot.slane %v1679_v27, %v3636_v7  ;;  %v1694_v33 = vrot.slane %v1680_v28, %v3636_v7 }
 0x4e1   : > { %v1278_v34 = vmul.f32 %v3433_v31, %v3741_v52  ;;  %3270 = vmatmul.mubr.msk.bf16.vlgmr.msra.gmra.mrb[12].mxu1 %vm1050_vm3, %v1281_v29 }
 0x4e2   : > { %v1699_v37 = vcombine.low %v1671_v39, %v1678_v32  ;;  %v3108_v38 = vcombine.high %v1671_v39, %v1678_v32  ;;  %v1715_v41 = vcombine.low %v1687_v53, %v1694_v33  ;;  %v3109_v42 = vcombine.high %v1687_v53, %v1694_v33  ;;  %3280 = vmatpush3.bf16.xpose.msra.mxu1 %v2075_v35 }
 0x4e3   : > { %v1282_v43 = vpack.c.bf16 %v1278_v34, %v1278_v34  ;;  %3281 = vmatprep.mubr.msk.bf16.mxu1 %vm3474_vm2, %v3473_v17  ;;  %3291 = vmatprep.subr.bf16.mxu1 %v3473_v17 }
 0x4e4   : > { %v1706_v52 = vrot.slane %v1699_v37, %v3633_v0  ;;  %v1714_v44 = vrot.slane %v3108_v38, %v3633_v0  ;;  %v1722_v45 = vrot.slane %v1715_v41, %v3633_v0  ;;  %v1730_v46 = vrot.slane %v3109_v42, %v3633_v0 }
 0x4e5   : > { %3276 = vmatmul.mubr.msk.bf16.vlgmr.msra.gmra.mrb[24].mxu0 %vm1050_vm3, %v1282_v43 }
 0x4e6   : > { %v1731_v49 = vcombine.low %v1706_v52, %v1714_v44  ;;  %v1747_v50 = vcombine.low %v1722_v45, %v1730_v46  ;;  %3286 = vmatpush3.bf16.xpose.msra.mxu0 %v2121_v48  ;;  %3287 = vmatprep.mubr.msk.bf16.mxu0 %vm3474_vm2, %v3473_v17  ;;  %v1732_v56 = vcombine.high %v1706_v52, %v1714_v44 }
 0x4e7   : > { %3297 = vmatprep.subr.bf16.mxu0 %v3473_v17  ;;  %v1748_v57 = vcombine.high %v1722_v45, %v1730_v46 }
 0x4e8   : > { %v1739_v58 = vrot.slane %v1731_v49, %v3636_v7  ;;  %v1755_v59 = vrot.slane %v1747_v50, %v3636_v7  ;;  %v1746_v3 = vrot.slane %v1732_v56, %v3636_v7 }
 0x4e9   : > { %v1762_v4 = vrot.slane %v1748_v57, %v3636_v7 }
 0x4ea   : > { %v1763_v60 = vcombine.low %v1739_v58, %v1755_v59  ;;  %v1764_v61 = vcombine.high %v1739_v58, %v1755_v59 }
 0x4eb   : > { %v1765_v24 = vcombine.low %v1746_v3, %v1762_v4  ;;  %v1766_v6 = vcombine.high %v1746_v3, %v1762_v4 }
 0x4ec   : > { %v1767_v1 = vpack.c.bf16 %v1763_v60, %v1763_v60  ;;  %v1768_v2 = vpack.c.bf16 %v1764_v61, %v1764_v61 }
 0x4ed   : > { %v1769_v8 = vpack.c.bf16 %v1765_v24, %v1765_v24  ;;  %v1770_v9 = vpack.c.bf16 %v1766_v6, %v1766_v6 }
 0x4ee   : > { %3282 = vmatmul.mubr.msk.bf16.vlgmr.msra.gmra.mrb[16].mxu1 %vm1050_vm3, %v1767_v1  ;;  %3288 = vmatmul.mubr.msk.bf16.vlgmr.msra.gmra.mrb[28].mxu0 %vm1050_vm3, %v1768_v2 }
 0x4ef   : > { %3292 = vmatpush3.bf16.xpose.msra.mxu1 %v2167_v19  ;;  %3298 = vmatpush3.bf16.xpose.msra.mxu0 %v2213_v5 }
 0x4f0   : > { %3293 = vmatprep.mubr.msk.bf16.mxu1 %vm3474_vm2, %v3473_v17  ;;  %3299 = vmatprep.mubr.msk.bf16.mxu0 %vm3474_vm2, %v3473_v17 }
 0x4f1   : > { %3303 = vmatprep.subr.bf16.mxu1 %v3473_v17  ;;  %3309 = vmatprep.subr.bf16.mxu0 %v3473_v17 }
 0x4f6   : > { %3294 = vmatmul.mubr.msk.bf16.vlgmr.msra.gmra.mrb[20].mxu1 %vm1050_vm3, %v1769_v8  ;;  %3300 = vmatmul.mubr.msk.bf16.vlgmr.msra.gmra.mrb[32].mxu0 %vm1050_vm3, %v1770_v9 }
 0x4f7   : > { %3305 = vmatprep.mubr.msk.bf16.mxu1 %vm3474_vm2, %v3473_v17  ;;  %3311 = vmatprep.mubr.msk.bf16.mxu0 %vm3474_vm2, %v3473_v17 }
 0x5ab   : > { %v1324_v10 = vpop.f32.mrb[8].mxu1 }
 0x5ac   : > { %v1370_v11 = vpop.f32.mrb[20].mxu0  ;;  %v3259_v47 = vpop.f32.mrb[9].mxu1 }
 0x5ad   : > { %v3265_v12 = vpop.f32.mrb[21].mxu0  ;;  %v1327_v13 = vpop.f32.mrb[10].mxu1 }
 0x5ae   : > { %v1373_v14 = vpop.f32.mrb[22].mxu0  ;;  %v3260_v15 = vpop.f32.mrb[11].mxu1 }
 0x5af   : > { %v3266_v16 = vpop.f32.mrb[23].mxu0 }
 0x5b4   : > { %v1416_v18 = vpop.f32.mrb[12].mxu1 }
 0x5b5   : > { %v1468_v20 = vcombine.low %v1324_v10, %v1416_v18  ;;  %v1469_v21 = vcombine.high %v1324_v10, %v1416_v18  ;;  %v3271_v22 = vpop.f32.mrb[13].mxu1 }
 0x5b6   : > { %v1419_v25 = vpop.f32.mrb[14].mxu1 }
 0x5b7   : > { %v3272_v27 = vpop.f32.mrb[15].mxu1  ;;  %v1476_v32 = vrot.slane %v1468_v20, %v3633_v0  ;;  %v1483_v53 = vrot.slane %v1469_v21, %v3633_v0 }
 0x5b8   : > { %v1462_v28 = vpop.f32.mrb[24].mxu0 }
 0x5b9   : > { %v1484_v29 = vcombine.low %v1370_v11, %v1462_v28  ;;  %v1485_v30 = vcombine.high %v1370_v11, %v1462_v28  ;;  %v3277_v31 = vpop.f32.mrb[25].mxu0 }
 0x5ba   : > { %v1465_v39 = vpop.f32.mrb[26].mxu0 }
 0x5bb   : > { %v1492_v33 = vrot.slane %v1484_v29, %v3633_v0  ;;  %v1499_v34 = vrot.slane %v1485_v30, %v3633_v0  ;;  %v3278_v35 = vpop.f32.mrb[27].mxu0 }
 0x5bd   : > { %v1500_v51 = vcombine.low %v1476_v32, %v1492_v33  ;;  %v1501_v36 = vcombine.high %v1476_v32, %v1492_v33  ;;  %v1516_v37 = vcombine.low %v1483_v53, %v1499_v34  ;;  %v1517_v38 = vcombine.high %v1483_v53, %v1499_v34 }
 0x5bf   : > { %v1508_v41 = vrot.slane %v1500_v51, %v3636_v7  ;;  %v1515_v42 = vrot.slane %v1501_v36, %v3636_v7  ;;  %v1524_v43 = vrot.slane %v1516_v37, %v3636_v7  ;;  %v1531_v52 = vrot.slane %v1517_v38, %v3636_v7 }
 0x5c1   : > { %v1536_v44 = vcombine.low %v1508_v41, %v1515_v42  ;;  %v3106_v45 = vcombine.high %v1508_v41, %v1515_v42  ;;  %v1552_v46 = vcombine.low %v1524_v43, %v1531_v52  ;;  %v3107_v48 = vcombine.high %v1524_v43, %v1531_v52  ;;  %v2111_v49 = vpop.f32.mrb[16].mxu1  ;;  %v2157_v50 = vpop.f32.mrb[28].mxu0 }
 0x5c2   : > { %v2112_v54 = vadd.f32 %v2111_v49, %v3695_v40  ;;  %v2158_v23 = vadd.f32 %v2157_v50, %v3695_v40  ;;  %v3283_v56 = vpop.f32.mrb[17].mxu1  ;;  %v3289_v57 = vpop.f32.mrb[29].mxu0 }
 0x5c3   : > { %v1543_v58 = vrot.slane %v1536_v44, %v3633_v0  ;;  %v1551_v59 = vrot.slane %v3106_v45, %v3633_v0  ;;  %v1559_v60 = vrot.slane %v1552_v46, %v3633_v0  ;;  %v1567_v61 = vrot.slane %v3107_v48, %v3633_v0  ;;  %v2114_v62 = vpop.f32.mrb[18].mxu1  ;;  %v2160_v63 = vpop.f32.mrb[30].mxu0 }
 0x5c4   : > { %v3284_v1 = vpop.f32.mrb[19].mxu1  ;;  %v3290_v2 = vpop.f32.mrb[31].mxu0  ;;  %v2255_v3 = vsel %vm1050_vm3, %v2112_v54, -inf  ;;  %v2258_v4 = vsel %vm1050_vm3, %v2158_v23, -inf }
 0x5c5   : > { %2256 = vmax.xlane.f32.xlu1 %v2255_v3  ;;  %2259 = vmax.xlane.f32.xlu0 %v2258_v4  ;;  %v1569_v19 = vcombine.high %v1543_v58, %v1551_v59  ;;  %v1585_v5 = vcombine.high %v1559_v60, %v1567_v61  ;;  %v1568_v24 = vcombine.low %v1543_v58, %v1551_v59 }
 0x5c6   : > { %v1584_v6 = vcombine.low %v1559_v60, %v1567_v61 }
 0x5c7   : > { %v3862_v8 = vrot.slane %v1569_v19, %v3636_v7  ;;  %v3865_v9 = vrot.slane %v1585_v5, %v3636_v7  ;;  %v3868_v10 = vrot.slane %v1568_v24, %v3636_v7 }
 0x5c8   : > { %v3871_v11 = vrot.slane %v1584_v6, %v3636_v7 }
 0x5c9   : > { %v2203_v47 = vpop.f32.mrb[20].mxu1  ;;  %v2249_v12 = vpop.f32.mrb[32].mxu0  ;;  %v1602_v13 = vcombine.low %v3862_v8, %v3865_v9  ;;  %v1603_v14 = vcombine.high %v3862_v8, %v3865_v9 }
 0x5ca   : > { %v2204_v15 = vadd.f32 %v2203_v47, %v3695_v40  ;;  %v3295_v16 = vpop.f32.mrb[21].mxu1  ;;  %v3301_v18 = vpop.f32.mrb[33].mxu0  ;;  %v1600_v20 = vcombine.low %v3868_v10, %v3871_v11  ;;  %v1601_v21 = vcombine.high %v3868_v10, %v3871_v11  ;;  %v2250_v27 = vadd.f32 %v2249_v12, %v3695_v40  ;;  %v3988_v11 = vld [vmem:[%s3552_s15] sm:$0x3f] }
 0x5cb   : > { %v2206_v22 = vpop.f32.mrb[22].mxu1  ;;  %v2252_v25 = vpop.f32.mrb[34].mxu0  ;;  %v2641_v10 = vsub.s32 0, %v3591_v26 }
 0x5cc   : > { %v3296_v28 = vpop.f32.mrb[23].mxu1  ;;  %v3302_v29 = vpop.f32.mrb[35].mxu0  ;;  %v2261_v30 = vsel %vm1050_vm3, %v2204_v15, -inf  ;;  %v2264_v31 = vsel %vm1050_vm3, %v2250_v27, -inf }
 0x5cd   : > { %2262 = vmax.xlane.f32.xlu0 %v2261_v30 }
 0x5d1   : > { %2265 = vmax.xlane.f32.xlu0 %v2264_v31 }
 0x5d6   : > { %1922 = vrot.lane.b32.xlu1 %v3628_v55, %s3476_s13 }
 0x652   : > { %v2257_v39 = vpop.xlane.xlu1 %2256  ;;  %v2260_v32 = vpop.xlane.xlu0 %2259 }
 0x653   : > { %v2267_v53 = vsub.f32 %v2112_v54, %v2257_v39  ;;  %v2268_v33 = vsub.f32 %v2158_v23, %v2260_v32 }
 0x655   : > { %v2271_v34 = vmul.f32 1.442695, %v2267_v53  ;;  %v2273_v35 = vmul.f32 1.442695, %v2268_v33 }
 0x656   : > { %v1923_v50 = vpop.permute.xlu1 %1922 }
 0x657   : > { %3434 = vpow2.f32 %v2271_v34 }
 0x658   : > { %3436 = vpow2.f32 %v2273_v35 }
 0x65a   : > { %v2263_v38 = vpop.xlane.xlu0 %2262 }
 0x65b   : > { %v2269_v42 = vsub.f32 %v2204_v15, %v2263_v38 }
 0x65d   : > { %v2275_v52 = vmul.f32 1.442695, %v2269_v42 }
 0x65e   : > { %v2266_v41 = vpop.xlane.xlu0 %2265 }
 0x65f   : > { %v2270_v43 = vsub.f32 %v2250_v27, %v2266_v41  ;;  %3438 = vpow2.f32 %v2275_v52 }
 0x661   : > { %v3887_v40 = vpop.eup %3434  ;;  %v2277_v44 = vmul.f32 1.442695, %v2270_v43 }
 0x662   : > { %v3889_v51 = vpop.eup %3436  ;;  %v2279_v36 = vsel %vm1050_vm3, %v3887_v40, 0.0 }
 0x663   : > { %2280 = vadd.xlane.f32.xlu1 %v2279_v36  ;;  %v2282_v37 = vsel %vm1050_vm3, %v3889_v51, 0.0  ;;  %3440 = vpow2.f32 %v2277_v44 }
 0x664   : > { %2283 = vadd.xlane.f32.xlu0 %v2282_v37 }
 0x669   : > { %v3899_v45 = vpop.eup %3438 }
 0x66a   : > { %v2285_v48 = vsel %vm1050_vm3, %v3899_v45, 0.0 }
 0x66d   : > { %v3901_v46 = vpop.eup %3440 }
 0x66e   : > { %v2288_v49 = vsel %vm1050_vm3, %v3901_v46, 0.0 }
 0x674   : > { %1928 = vrot.lane.b32.xlu1 %v3628_v55, %s3477_s14 }
 0x67a   : > { %1925 = vrot.lane.b32.xlu0 %v3628_v55, %s3475_s30 }
 0x698   : > { %2286 = vadd.xlane.f32.xlu1 %v2285_v48 }
 0x699   : > { %2289 = vadd.xlane.f32.xlu0 %v2288_v49 }
 0x6f0   : > { %v2281_v54 = vpop.xlane.xlu1 %2280 }
 0x6f1   : > { %v2284_v23 = vpop.xlane.xlu0 %2283  ;;  %3442 = vrcp.f32 %v2281_v54 }
 0x6f2   : > { %3444 = vrcp.f32 %v2284_v23 }
 0x6f4   : > { %v1929_v56 = vpop.permute.xlu1 %1928 }
 0x6f5   : > { %v1947_v57 = vcombine.low %v1923_v50, %v1929_v56  ;;  %v1948_v58 = vcombine.high %v1923_v50, %v1929_v56  ;;  %v1926_v59 = vpop.permute.xlu0 %1925 }
 0x6f6   : > { %v1931_v60 = vcombine.low %v3628_v55, %v1926_v59  ;;  %v1932_v61 = vcombine.high %v3628_v55, %v1926_v59 }
 0x6f7   : > { %v1955_v62 = vrot.slane %v1947_v57, %v3633_v0  ;;  %v1962_v63 = vrot.slane %v1948_v58, %v3633_v0 }
 0x6f8   : > { %v1939_v1 = vrot.slane %v1931_v60, %v3633_v0  ;;  %v1946_v2 = vrot.slane %v1932_v61, %v3633_v0 }
 0x6fa   : > { %v1963_v3 = vcombine.low %v1939_v1, %v1955_v62  ;;  %v1964_v4 = vcombine.high %v1939_v1, %v1955_v62  ;;  %v1979_v19 = vcombine.low %v1946_v2, %v1962_v63  ;;  %v1980_v5 = vcombine.high %v1946_v2, %v1962_v63 }
 0x6fb   : > { %v3443_v33 = vpop.eup %3442 }
 0x6fc   : > { %v1971_v24 = vrot.slane %v1963_v3, %v3636_v7  ;;  %v1978_v6 = vrot.slane %v1964_v4, %v3636_v7  ;;  %v1987_v55 = vrot.slane %v1979_v19, %v3636_v7  ;;  %v1994_v47 = vrot.slane %v1980_v5, %v3636_v7  ;;  %v3445_v36 = vpop.eup %3444 }
 0x6fd   : > { %v2295_v43 = vmul.f32 %v3443_v33, %v3887_v40  ;;  %v2296_v52 = vmul.f32 %v3445_v36, %v3889_v51 }
 0x6fe   : > { %v1999_v12 = vcombine.low %v1971_v24, %v1978_v6  ;;  %v3112_v15 = vcombine.high %v1971_v24, %v1978_v6  ;;  %v2015_v16 = vcombine.low %v1987_v55, %v1994_v47  ;;  %v3113_v18 = vcombine.high %v1987_v55, %v1994_v47 }
 0x6ff   : > { %v2299_v56 = vpack.c.bf16 %v2295_v43, %v2295_v43  ;;  %v2300_v57 = vpack.c.bf16 %v2296_v52, %v2296_v52 }
 0x700   : > { %v2006_v22 = vrot.slane %v1999_v12, %v3633_v0  ;;  %v2014_v25 = vrot.slane %v3112_v15, %v3633_v0  ;;  %v2022_v27 = vrot.slane %v2015_v16, %v3633_v0  ;;  %v2030_v28 = vrot.slane %v3113_v18, %v3633_v0 }
 0x702   : > { %v2031_v29 = vcombine.low %v2006_v22, %v2014_v25  ;;  %v2032_v30 = vcombine.high %v2006_v22, %v2014_v25  ;;  %v2047_v31 = vcombine.low %v2022_v27, %v2030_v28  ;;  %v2048_v39 = vcombine.high %v2022_v27, %v2030_v28 }
 0x704   : > { %v2039_v32 = vrot.slane %v2031_v29, %v3636_v7  ;;  %v2046_v53 = vrot.slane %v2032_v30, %v3636_v7  ;;  %v2055_v34 = vrot.slane %v2047_v31, %v3636_v7  ;;  %v2062_v35 = vrot.slane %v2048_v39, %v3636_v7 }
 0x706   : > { %v2063_v37 = vcombine.low %v2039_v32, %v2055_v34  ;;  %v2064_v38 = vcombine.high %v2039_v32, %v2055_v34  ;;  %v2065_v41 = vcombine.low %v2046_v53, %v2062_v35  ;;  %v2066_v42 = vcombine.high %v2046_v53, %v2062_v35 }
 0x708   : > { %v2067_v44 = vpack.c.bf16 %v2063_v37, %v2063_v37  ;;  %v2068_v48 = vpack.c.bf16 %v2064_v38, %v2064_v38  ;;  %v2069_v54 = vpack.c.bf16 %v2065_v41, %v2065_v41  ;;  %v2070_v23 = vpack.c.bf16 %v2066_v42, %v2066_v42 }
 0x70a   : > { %v2307_v49 = vsel %vm1286_vm5, %v2067_v44, 0  ;;  %v2353_v50 = vsel %vm1286_vm5, %v2068_v48, 0  ;;  %v2399_v40 = vsel %vm1286_vm5, %v2069_v54, 0  ;;  %v2445_v51 = vsel %vm1286_vm5, %v2070_v23, 0 }
 0x70b   : > { %3304 = vmatpush3.bf16.msra.mxu1 %v2307_v49  ;;  %3310 = vmatpush3.bf16.msra.mxu0 %v2353_v50  ;;  %v3402_v49 = vld [vmem:[%s3547_s12 + $0x30] sm:$0xff]  }
 0x70c   : > { %3315 = vmatprep.subr.bf16.mxu1 %v3473_v17  ;;  %3321 = vmatprep.subr.bf16.mxu0 %v3473_v17 }
 0x70e   : > { %3306 = vmatmul.mubr.msk.bf16.vlgmr.msra.gmra.mrb[24].mxu1 %vm1050_vm3, %v2299_v56  ;;  %3312 = vmatmul.mubr.msk.bf16.vlgmr.msra.gmra.mrb[36].mxu0 %vm1050_vm3, %v2300_v57 }
 0x70f   : > { %3316 = vmatpush3.bf16.msra.mxu1 %v2399_v40  ;;  %3322 = vmatpush3.bf16.msra.mxu0 %v2445_v51 }
 0x710   : > { %3317 = vmatprep.mubr.msk.bf16.mxu1 %vm3474_vm2, %v3473_v17  ;;  %3323 = vmatprep.mubr.msk.bf16.mxu0 %vm3474_vm2, %v3473_v17 }
 0x711   : > { %3327 = vmatprep.subr.bf16.mxu1 %v3473_v17  ;;  %3335 = vmatprep.subr.bf16.mxu0 %v3473_v17 }
 0x725   : > { %v2287_v58 = vpop.xlane.xlu1 %2286 }
 0x726   : > { %3446 = vrcp.f32 %v2287_v58  ;;  %v2290_v59 = vpop.xlane.xlu0 %2289 }
 0x727   : > { %3448 = vrcp.f32 %v2290_v59  ;;  %v3403_v59 = vld [vmem:[%s3547_s12 + $0x38] sm:$0xff]   ;;  %s3480_s12 = smov 16  }
 0x730   : > { %v3447_v60 = vpop.eup %3446 }
 0x731   : > { %v3449_v61 = vpop.eup %3448  ;;  %v2297_v62 = vmul.f32 %v3447_v60, %v3899_v45 }
 0x732   : > { %v2298_v63 = vmul.f32 %v3449_v61, %v3901_v46 }
 0x733   : > { %v2301_v1 = vpack.c.bf16 %v2297_v62, %v2297_v62 }
 0x734   : > { %v2302_v2 = vpack.c.bf16 %v2298_v63, %v2298_v63 }
 0x735   : > { %3318 = vmatmul.mubr.msk.bf16.vlgmr.msra.gmra.mrb[28].mxu1 %vm1050_vm3, %v2301_v1 }
 0x736   : > { %3324 = vmatmul.mubr.msk.bf16.vlgmr.msra.gmra.mrb[40].mxu0 %vm1050_vm3, %v2302_v2  ;;  %3331 = vmatprep.mubr.msk.bf16.mxu1 %vm3474_vm2, %v3473_v17 }
 0x737   : > { %3339 = vmatprep.mubr.msk.bf16.mxu0 %vm3474_vm2, %v3473_v17  ;;  %3328 = vmatpush3.bf16.msra.mxu1 %v3402_v49  ;;  %v3404_v49 = vld [vmem:[%s3562_s22] sm:$0xff]  }
 0x738   : > { %3329 = vmatprep.subr.bf16.mxu1 %v3473_v17  ;;  %3336 = vmatpush3.bf16.msra.mxu0 %v3404_v49 }
 0x739   : > { %3337 = vmatprep.subr.bf16.mxu0 %v3473_v17 }
 0x73b   : > { %3330 = vmatpush3.bf16.msra.mxu1 %v3403_v59 }
 0x73c   : > { %3343 = vmatprep.subr.bf16.mxu1 %v3473_v17 }
 0x7e1   : > { %v2343_v3 = vpop.f32.mrb[24].mxu1  ;;  %v2389_v4 = vpop.f32.mrb[36].mxu0 }
 0x7e2   : > { %v3307_v19 = vpop.f32.mrb[25].mxu1  ;;  %v3313_v5 = vpop.f32.mrb[37].mxu0 }
 0x7e3   : > { %v2346_v24 = vpop.f32.mrb[26].mxu1  ;;  %v2392_v45 = vpop.f32.mrb[38].mxu0 }
 0x7e4   : > { %v3308_v6 = vpop.f32.mrb[27].mxu1  ;;  %v3314_v46 = vpop.f32.mrb[39].mxu0 }
 0x808   : > { %v2435_v55 = vpop.f32.mrb[28].mxu1 }
 0x809   : > { %v2487_v47 = vcombine.low %v2343_v3, %v2435_v55  ;;  %v2488_v12 = vcombine.high %v2343_v3, %v2435_v55  ;;  %v2481_v15 = vpop.f32.mrb[40].mxu0  ;;  %v3319_v16 = vpop.f32.mrb[29].mxu1 }
 0x80a   : > { %v2503_v18 = vcombine.low %v2389_v4, %v2481_v15  ;;  %v2504_v22 = vcombine.high %v2389_v4, %v2481_v15  ;;  %v3325_v25 = vpop.f32.mrb[41].mxu0  ;;  %v2438_v27 = vpop.f32.mrb[30].mxu1 }
 0x80b   : > { %v2495_v28 = vrot.slane %v2487_v47, %v3633_v0  ;;  %v2502_v29 = vrot.slane %v2488_v12, %v3633_v0  ;;  %v2484_v30 = vpop.f32.mrb[42].mxu0  ;;  %v3320_v31 = vpop.f32.mrb[31].mxu1 }
 0x80c   : > { %v2511_v39 = vrot.slane %v2503_v18, %v3633_v0  ;;  %v2518_v32 = vrot.slane %v2504_v22, %v3633_v0  ;;  %v3326_v53 = vpop.f32.mrb[43].mxu0 }
 0x80e   : > { %v2519_v33 = vcombine.low %v2495_v28, %v2511_v39  ;;  %v2520_v34 = vcombine.high %v2495_v28, %v2511_v39  ;;  %v2535_v35 = vcombine.low %v2502_v29, %v2518_v32  ;;  %v2536_v36 = vcombine.high %v2502_v29, %v2518_v32  ;;  %v3459_v29 = vld [vmem:[#allocation2] sm:$0xff]  ;;  %v3460_v32 = vld [vmem:[#allocation2 + $0x8] sm:$0xff] }
 0x810   : > { %v2527_v37 = vrot.slane %v2519_v33, %v3636_v7  ;;  %v2534_v38 = vrot.slane %v2520_v34, %v3636_v7  ;;  %v2543_v41 = vrot.slane %v2535_v35, %v3636_v7  ;;  %v2550_v42 = vrot.slane %v2536_v36, %v3636_v7 }
 0x812   : > { %v2555_v43 = vcombine.low %v2527_v37, %v2534_v38  ;;  %v3122_v52 = vcombine.high %v2527_v37, %v2534_v38  ;;  %v2571_v44 = vcombine.low %v2543_v41, %v2550_v42  ;;  %v3123_v48 = vcombine.high %v2543_v41, %v2550_v42 }
 0x814   : > { %v2562_v50 = vrot.slane %v2555_v43, %v3633_v0  ;;  %v2570_v54 = vrot.slane %v3122_v52, %v3633_v0  ;;  %v2578_v23 = vrot.slane %v2571_v44, %v3633_v0  ;;  %v2586_v56 = vrot.slane %v3123_v48, %v3633_v0 }
 0x816   : > { %v2588_v57 = vcombine.high %v2562_v50, %v2570_v54  ;;  %v2604_v40 = vcombine.high %v2578_v23, %v2586_v56  ;;  %v2587_v51 = vcombine.low %v2562_v50, %v2570_v54  ;;  %v2603_v58 = vcombine.low %v2578_v23, %v2586_v56  ;;  %v3405_v50 = vld [vmem:[%s3562_s22 + $0x8] sm:$0xff]  }
 0x817   : > { %3338 = vmatpush3.bf16.msra.mxu0 %v3405_v50 }
 0x818   : > { %v2602_v60 = vrot.slane %v2588_v57, %v3636_v7  ;;  %v2618_v61 = vrot.slane %v2604_v40, %v3636_v7  ;;  %v2595_v62 = vrot.slane %v2587_v51, %v3636_v7  ;;  %v2611_v63 = vrot.slane %v2603_v58, %v3636_v7 }
 0x819   : > { %v2729_v58 = vsub.s32 3, %v3591_v26 }
 0x81a   : > { %v2621_v0 = vcombine.low %v2602_v60, %v2618_v61  ;;  %v2620_v1 = vcombine.high %v2595_v62, %v2611_v63  ;;  %v2619_v2 = vcombine.low %v2595_v62, %v2611_v63  ;;  %v2622_v3 = vcombine.high %v2602_v60, %v2618_v61 }
 0x81b   : > { %v2730_v60 = vrot.slane %v3988_v11, %v2729_v58  ;;  %v2735_v62 = vsub.s32 4, %v3591_v26 }
 0x81c   : > { %v3386_v4 = vpack.i.bf16 %v2621_v0, %v1602_v13  ;;  %v3381_v19 = vpack.i.bf16 %v2620_v1, %v1601_v21  ;;  %v3391_v5 = vpack.i.bf16 %v2622_v3, %v1603_v14 }
 0x81e   : > { %3387 = vrot.lane.b32.xlu1 %v3386_v4, %s3480_s12  ;;  %3382 = vrot.lane.b32.xlu0 %v3381_v19, %s3481_s16 }
 0x822   : > { %3392 = vrot.lane.b32.xlu1 %v3391_v5, %s3482_s17 }
 0x890   : > { %v3388_v7 = vpop.permute.xlu1 %3387  ;;  %v3383_v24 = vpop.permute.xlu0 %3382 }
 0x891   : > { %v3385_v45 = vunpack.i.h.bf16 %v3383_v24  ;;  %v3384_v6 = vunpack.i.l.bf16 %v3383_v24  ;;  %v3390_v46 = vunpack.i.h.bf16 %v3388_v7  ;;  %v3389_v13 = vunpack.i.l.bf16 %v3388_v7  ;;  %v3406_v7 = vld [vmem:[%s3567_s25] sm:$0xff]   ;;  %v3407_v24 = vld [vmem:[%s3567_s25 + $0x8] sm:$0xff]  }
 0x893   : > { %v1616_v21 = vsel %vm1050_vm3, %v1600_v20, %v3384_v6  ;;  %v2635_v8 = vsel %vm1050_vm3, %v2619_v2, %v3385_v45  ;;  %v2642_v20 = vrot.slane %v3988_v11, %v2641_v10  ;;  %v2736_v2 = vrot.slane %v3988_v11, %v2735_v62  ;;  %v3408_v45 = vld [vmem:[%s3567_s25 + $0x10] sm:$0xff]   ;;  %v3409_v6 = vld [vmem:[%s3567_s25 + $0x18] sm:$0xff]  }
 0x894   : > { %v3393_v9 = vpop.permute.xlu1 %3392  ;;  %v1618_v47 = vsel %vm1617_vm6, %v1616_v21, %v3389_v13  ;;  %v2636_v12 = vsel %vm1617_vm6, %v2635_v8, %v3390_v46  ;;  %v3410_v46 = vld [vmem:[%s3567_s25 + $0x20] sm:$0xff]   ;;  %v3411_v13 = vld [vmem:[%s3567_s25 + $0x28] sm:$0xff]   ;;  %v3412_v21 = vld [vmem:[%s3567_s25 + $0x30] sm:$0xff]  }
 0x895   : > { %v3395_v14 = vunpack.i.h.bf16 %v3393_v9  ;;  %v3394_v55 = vunpack.i.l.bf16 %v3393_v9  ;;  %v3413_v8 = vld [vmem:[%s3567_s25 + $0x38] sm:$0xff]   ;;  %v3127_v9 = vld [vmem:[%s356_s19] ss:$0 sm:$0xff] }
 0x897   : > { %v1620_v15 = vsel %vm1619_vm7, %v1618_v47, %v3394_v55  ;;  %v2637_v16 = vsel %vm1619_vm7, %v2636_v12, %v3395_v14 }
 0x898   : > { %v2638_v18 = vpack.c.bf16 %v2637_v16, %v1620_v15 }
 0x89a   : > { %3332 = vmatmul.mubr.msk.bf16.vlgmr.msra.gmra.mrb[32].mxu1 %vm391_vm1, %v2638_v18 }
 0x89b   : > { %3359 = vmatprep.mubr.msk.bf16.mxu1 %vm3474_vm2, %v3473_v17  ;;  %3344 = vmatpush3.bf16.msra.mxu1 %v3406_v7 }
 0x89c   : > { %3345 = vmatprep.subr.bf16.mxu1 %v3473_v17 }
 0x89f   : > { %3346 = vmatpush3.bf16.msra.mxu1 %v3407_v24  ;;  %v3141_v24 = vld [vmem:[%s4064_s7] ss:$0 sm:$0xff] (!%p3139_p5) }
 0x8a0   : > { %3347 = vmatprep.subr.bf16.mxu1 %v3473_v17 }
 0x8a3   : > { %3348 = vmatpush3.bf16.msra.mxu1 %v3408_v45 }
 0x8a4   : > { %3349 = vmatprep.subr.bf16.mxu1 %v3473_v17 }
 0x8a7   : > { %3350 = vmatpush3.bf16.msra.mxu1 %v3409_v6 }
 0x8a8   : > { %3351 = vmatprep.subr.bf16.mxu1 %v3473_v17 }
 0x8ab   : > { %3352 = vmatpush3.bf16.msra.mxu1 %v3410_v46 }
 0x8ac   : > { %3353 = vmatprep.subr.bf16.mxu1 %v3473_v17 }
 0x8af   : > { %3354 = vmatpush3.bf16.msra.mxu1 %v3411_v13 }
 0x8b0   : > { %3355 = vmatprep.subr.bf16.mxu1 %v3473_v17 }
 0x8b3   : > { %3356 = vmatpush3.bf16.msra.mxu1 %v3412_v21 }
 0x8b4   : > { %3357 = vmatprep.subr.bf16.mxu1 %v3473_v17 }
 0x8b7   : > { %3358 = vmatpush3.bf16.msra.mxu1 %v3413_v8 }
 0x96d   : > { %v2692_v22 = vpop.f32.mrb[32].mxu1 }
 0x96e   : > { %v2693_v25 = vadd.f32 %v2692_v22, %v2642_v20  ;;  %v3333_v27 = vpop.f32.mrb[33].mxu1 }
 0x96f   : > { %v2695_v28 = vpop.f32.mrb[34].mxu1 }
 0x970   : > { %v3991_v30 = vadd.f32 %v3459_v29, %v2693_v25  ;;  %v2696_v31 = vadd.f32 %v2695_v28, %v2642_v20  ;;  %v3334_v39 = vpop.f32.mrb[35].mxu1 }
 0x972   : > { %v3993_v53 = vadd.f32 %v3460_v32, %v2696_v31  ;;  %v2701_v33 = vsel %vm391_vm1, %v3991_v30, 0.0 }
 0x973   : > { %2702 = vadd.xlane.f32.xlu1 %v2701_v33 }
 0x974   : > { %v2704_v34 = vsel %vm391_vm1, %v3993_v53, 0.0 }
 0x975   : > { %2705 = vadd.xlane.f32.xlu0 %v2704_v34 }
 0xa00   : > { %v2703_v35 = vpop.xlane.xlu1 %2702 }
 0xa01   : > { %v2707_v36 = vmul.f32 0.03125, %v2703_v35 }
 0xa02   : > { %v2706_v37 = vpop.xlane.xlu0 %2705 }
 0xa03   : > { %v2709_v38 = vsub.f32 %v3991_v30, %v2707_v36  ;;  %v2708_v41 = vmul.f32 0.03125, %v2706_v37 }
 0xa05   : > { %v2710_v42 = vsub.f32 %v3993_v53, %v2708_v41  ;;  %v2711_v43 = vmul.f32 %v2709_v38, %v2709_v38 }
 0xa07   : > { %v2713_v52 = vsel %vm391_vm1, %v2711_v43, 0.0  ;;  %v2712_v44 = vmul.f32 %v2710_v42, %v2710_v42 }
 0xa08   : > { %2714 = vadd.xlane.f32.xlu0 %v2713_v52 }
 0xa09   : > { %v2716_v48 = vsel %vm391_vm1, %v2712_v44, 0.0 }
 0xa0c   : > { %2717 = vadd.xlane.f32.xlu0 %v2716_v48 }
 0xa95   : > { %v2715_v54 = vpop.xlane.xlu0 %2714 }
 0xa96   : > { %v2719_v23 = vmul.f32 0.03125, %v2715_v54 }
 0xa98   : > { %v2721_v56 = vadd.f32 1e-05, %v2719_v23 }
 0xa99   : > { %v2718_v57 = vpop.xlane.xlu0 %2717 }
 0xa9a   : > { %3450 = vrsqrt.f32 %v2721_v56  ;;  %v2720_v40 = vmul.f32 0.03125, %v2718_v57 }
 0xa9c   : > { %v2722_v51 = vadd.f32 1e-05, %v2720_v40 }
 0xa9e   : > { %3452 = vrsqrt.f32 %v2722_v51 }
 0xaa4   : > { %v3451_v59 = vpop.eup %3450 }
 0xaa5   : > { %v2725_v61 = vmul.f32 %v3451_v59, %v2709_v38 }
 0xaa7   : > { %v2731_v0 = vmul.f32 %v2730_v60, %v2725_v61 }
 0xaa8   : > { %v3453_v63 = vpop.eup %3452 }
 0xaa9   : > { %v2726_v1 = vmul.f32 %v3453_v63, %v2710_v42  ;;  %v2737_v4 = vadd.f32 %v2736_v2, %v2731_v0  ;;  %v2844_v42 = vsub.s32 5, %v3591_v26 }
 0xaab   : > { %v2732_v3 = vmul.f32 %v2730_v60, %v2726_v1  ;;  %v2845_v43 = vrot.slane %v3988_v11, %v2844_v42 }
 0xaad   : > { %v2738_v19 = vadd.f32 %v2736_v2, %v2732_v3 }
 0xaaf   : > { %v2739_v5 = vpack.c.bf16 %v2738_v19, %v2737_v4 }
 0xab1   : > { %3340 = vmatmul.mubr.msk.bf16.vlgmr.msra.gmra.mrb[44].mxu0 %vm391_vm1, %v2739_v5  ;;  %v3140_v5 = vld [vmem:[%s4063_s6] ss:$0 sm:$0xff] (!%p3139_p5) }
 0xb84   : > { %v2800_v14 = vpop.f32.mrb[44].mxu0 }
 0xb85   : > { %v2801_v55 = vadd.f32 %v3127_v9, %v2800_v14  ;;  %v3341_v47 = vpop.f32.mrb[45].mxu0 }
 0xb86   : > { %v2803_v12 = vpop.f32.mrb[46].mxu0 }
 0xb87   : > { %v2809_v15 = vmul.f32 %v2801_v55, %v2801_v55  ;;  %v2804_v16 = vadd.f32 %v3127_v9, %v2803_v12  ;;  %v3342_v18 = vpop.f32.mrb[47].mxu0  ;;  %v2807_v34 = vmul.f32 0.5, %v2801_v55 }
 0xb89   : > { %v2811_v10 = vmul.f32 %v2809_v15, %v2801_v55  ;;  %v2810_v20 = vmul.f32 %v2804_v16, %v2804_v16  ;;  %v2808_v35 = vmul.f32 0.5, %v2804_v16 }
 0xb8b   : > { %v2813_v22 = vmul.f32 0.044715, %v2811_v10  ;;  %v2812_v25 = vmul.f32 %v2810_v20, %v2804_v16 }
 0xb8d   : > { %v2815_v27 = vadd.f32 %v2813_v22, %v2801_v55  ;;  %v2814_v28 = vmul.f32 0.044715, %v2812_v25 }
 0xb8f   : > { %v2817_v17 = vmul.f32 0.7978845, %v2815_v27  ;;  %v2816_v29 = vadd.f32 %v2814_v28, %v2804_v16 }
 0xb91   : > { %3454 = vtanh.f32 %v2817_v17  ;;  %v2818_v31 = vmul.f32 0.7978845, %v2816_v29 }
 0xb93   : > { %3456 = vtanh.f32 %v2818_v31 }
 0xb9b   : > { %v3455_v39 = vpop.eup %3454 }
 0xb9c   : > { %v2821_v32 = vadd.f32 1.0, %v3455_v39 }
 0xb9d   : > { %v3457_v33 = vpop.eup %3456 }
 0xb9e   : > { %v2822_v36 = vadd.f32 1.0, %v3457_v33  ;;  %v2823_v37 = vmul.f32 %v2821_v32, %v2807_v34 }
 0xba0   : > { %v2824_v38 = vmul.f32 %v2822_v36, %v2808_v35 }
 0xba2   : > { %v2825_v41 = vpack.c.bf16 %v2824_v38, %v2823_v37 }
 0xba4   : > { %3360 = vmatmul.mubr.bf16.vlgmr.msra.gmra.mrb[36].mxu1 %v2825_v41 }
 0xc77   : > { %v2928_v52 = vpop.f32.mrb[36].mxu1 }
 0xc78   : > { %v2929_v44 = vadd.f32 %v2928_v52, %v2845_v43  ;;  %v3361_v48 = vpop.f32.mrb[37].mxu1  ;;  %2942 = sbr.rel (%p3139_p5) target bundleno = 3516 (0xdbc), region = 60 }
 0xc79   : > { %v2931_v49 = vpop.f32.mrb[38].mxu1 }
 0xc7a   : > { %v2935_v50 = vadd.f32 %v2929_v44, %v3991_v30  ;;  %v2932_v54 = vadd.f32 %v2931_v49, %v2845_v43  ;;  %v3362_v23 = vpop.f32.mrb[39].mxu1 }
 0xc7c   : > { %2937 = vst.msk [vmem:[#allocation2] sm:$0xff] %vm391_vm1, %v2935_v50  ;;  %v2936_v56 = vadd.f32 %v2932_v54, %v3993_v53  ;;  %v2945_v26 = vsel (!%p3139_p5), %vm391_vm1, %v2935_v50, 0.0 }
 0xc7d   : > { %2946 = vadd.xlane.f32.xlu0 (!%p3139_p5), %v2945_v26 }
 0xc7e   : > { %2938 = vst.msk [vmem:[#allocation2 + $0x8] sm:$0xff] %vm391_vm1, %v2936_v56  ;;  %v2948_v11 = vsel (!%p3139_p5), %vm391_vm1, %v2936_v56, 0.0 }
 0xc81   : > { %2949 = vadd.xlane.f32.xlu0 %v2948_v11 }
 0xd0a   : > { %v2947_v57 = vpop.xlane.xlu0 %2946 }
 0xd0b   : > { %v2951_v40 = vmul.f32 0.03125, %v2947_v57 }
 0xd0d   : > { %v2953_v30 = vsub.f32 %v2935_v50, %v2951_v40 }
 0xd0e   : > { %v2950_v51 = vpop.xlane.xlu0 %2949 }
 0xd0f   : > { %v2952_v58 = vmul.f32 0.03125, %v2950_v51  ;;  %v2955_v59 = vmul.f32 %v2953_v30, %v2953_v30 }
 0xd11   : > { %v2954_v60 = vsub.f32 %v2936_v56, %v2952_v58  ;;  %v2957_v53 = vsel %vm391_vm1, %v2955_v59, 0.0 }
 0xd12   : > { %2958 = vadd.xlane.f32.xlu1 %v2957_v53 }
 0xd13   : > { %v2956_v61 = vmul.f32 %v2954_v60, %v2954_v60 }
 0xd15   : > { %v2960_v62 = vsel %vm391_vm1, %v2956_v61, 0.0 }
 0xd16   : > { %2961 = vadd.xlane.f32.xlu1 %v2960_v62 }
 0xd9f   : > { %v2959_v63 = vpop.xlane.xlu1 %2958 }
 0xda0   : > { %v2963_v0 = vmul.f32 0.03125, %v2959_v63 }
 0xda2   : > { %v2965_v1 = vadd.f32 1e-05, %v2963_v0 }
 0xda3   : > { %v2962_v2 = vpop.xlane.xlu1 %2961 }
 0xda4   : > { %3461 = vrsqrt.f32 %v2965_v1  ;;  %v2964_v3 = vmul.f32 0.03125, %v2962_v2 }
 0xda6   : > { %v2966_v4 = vadd.f32 1e-05, %v2964_v3 }
 0xda8   : > { %3463 = vrsqrt.f32 %v2966_v4 }
 0xdae   : > { %v3462_v19 = vpop.eup %3461 }
 0xdaf   : > { %v2969_v7 = vmul.f32 %v3462_v19, %v2953_v30 }
 0xdb1   : > { %v2977_v45 = vmul.f32 %v3140_v5, %v2969_v7 }
 0xdb2   : > { %v3464_v6 = vpop.eup %3463 }
 0xdb3   : > { %v2985_v46 = vadd.f32 %v3141_v24, %v2977_v45  ;;  %v2970_v13 = vmul.f32 %v3464_v6, %v2954_v60 }
 0xdb5   : > { %v3149_v21 = vpack.c.bf16 %v2985_v46, %v2985_v46  ;;  %v2978_v8 = vmul.f32 %v3140_v5, %v2970_v13 }
 0xdb7   : > { %2996 = vst.msk [vmem:[%s4065_s8] sm:$0xf] %vm2995_vm8, %v3149_v21  ;;  %v2986_v9 = vadd.f32 %v3141_v24, %v2978_v8 }
 0xdb9   : > { %v3150_v14 = vpack.c.bf16 %v2986_v9, %v2986_v9 }
 0xdbb   : > { %2997 = vst.msk [vmem:[%s4065_s8 + $0x4] sm:$0xf] %vm2995_vm8, %v3150_v14 }
 0xdbc PF: > { %s18_s27 = sadd.s32 1, %s3471_s27  }
 0xdbd   : > { %p15_p6 = scmp.ge.s32.totalorder %s18_s27, 4  }
 0xdbf   :  { %17 = sbr.rel (!%p15_p6) target bundleno = 1 (0x1), region = 98 }

</bundles_post_ra>
